<compile_context>
chip_gen: v6e
topology: v6e:2x2x1
jax: 0.10.0
libtpu: 0.0.40
codegen_flags: <defaults>
</compile_context>

<pallas_src>
import functools
import math

import jax
import jax.numpy as jnp
from jax.experimental import pallas as pl
from jax.experimental.pallas import tpu as pltpu

# Scoped-VMEM budget: above the 16/32 MiB defaults, below v7x's 64 MiB physical VMEM.
_VMEM_LIMIT_BYTES = 48 * 1024 * 1024


def _round_up(x, m):
    return ((x + m - 1) // m) * m


def _pick_b_block(batch):
    """Batch rows per recurrence block: MXU-native sizes for big batches,
    8-sublane minimum for tiny ones."""
    b8 = _round_up(batch, 8)
    if b8 >= 512:
        return 256
    if b8 >= 128:
        return 128
    return b8


# --------------------------------------------------------------------------- #
# Phase 1: tiled matmul + bias (hoisted input projection over all timesteps).
# --------------------------------------------------------------------------- #
def _matmul_bias_kernel(x_ref, w_ref, b_ref, o_ref):
    acc = jnp.dot(x_ref[...], w_ref[...], preferred_element_type=jnp.float32)
    o_ref[...] = (acc + b_ref[...]).astype(o_ref.dtype)


def _matmul_bias(x, w, b, out_dtype, tile_m=512, tile_n=512):
    """x: (M, K), w: (K, N), b: (1, N) f32 -> (M, N) out_dtype.
    M must be a multiple of 8, N a multiple of 128."""
    M, K = x.shape
    N = w.shape[1]
    # Never let the M tile degenerate (gcd-style): pad M up to the target tile.
    tm = tile_m if M >= tile_m else M
    M_pad = _round_up(M, tm)
    if M_pad != M:
        x = jnp.zeros((M_pad, K), x.dtype).at[:M].set(x)
    # N tiling keeps each (tm, tn) output + (K, tn) weight block inside scoped VMEM.
    tn = tile_n if (N >= tile_n and N % tile_n == 0) else N
    out = pl.pallas_call(
        _matmul_bias_kernel,
        out_shape=jax.ShapeDtypeStruct((M_pad, N), out_dtype),
        grid=(M_pad // tm, N // tn),
        in_specs=[
            pl.BlockSpec((tm, K), lambda i, j: (i, 0)),
            pl.BlockSpec((K, tn), lambda i, j: (0, j)),
            pl.BlockSpec((1, tn), lambda i, j: (0, j)),
        ],
        out_specs=pl.BlockSpec((tm, tn), lambda i, j: (i, j)),
        compiler_params=pltpu.CompilerParams(
            dimension_semantics=("parallel", "parallel"),
            vmem_limit_bytes=_VMEM_LIMIT_BYTES),
    )(x, w, b)
    return out[:M] if M_pad != M else out


# --------------------------------------------------------------------------- #
# Phase 2+3: recurrence + fused Linear head.
#   zx_ref  : (t_chunk, b_block, 4*H_pad)  precomputed x-projection + bias
#   wout_ref: (H_pad, P_pad), bout_ref: (1, P_pad)
#   whh_hbm : (H_pad, 4*H_pad) raw HBM ref (memory_space=pl.ANY)
#   y_ref   : (t_chunk, b_block, P_pad)    fused head output
#   scratch : staged W_hh, per-chunk hidden states, h/c state (f32), DMA sem
# --------------------------------------------------------------------------- #
def _lstm_recurrence_kernel(zx_ref, wout_ref, bout_ref, whh_hbm, y_ref,
                            whh_vmem, hs_ref, h_ref, c_ref, dma_sem):
    # NOTE: h/c persist in VMEM scratch across time chunks. This is only correct
    # because the TIME axis is the innermost grid axis and is marked "arbitrary".
    t_chunk, b_block, _ = zx_ref.shape
    H = h_ref.shape[1]
    cdtype = whh_vmem.dtype

    @pl.when(pl.program_id(1) == 0)
    def _():
        # First time-chunk of this batch block: stage the constant recurrent
        # weights into a SINGLE VMEM buffer (no pipeline double-buffering) and
        # reset the carried state.
        cp = pltpu.make_async_copy(whh_hbm, whh_vmem, dma_sem)
        cp.start()
        cp.wait()
        h_ref[...] = jnp.zeros_like(h_ref)
        c_ref[...] = jnp.zeros_like(c_ref)

    def step(t, carry):
        h, c = carry
        # One MXU matmul per step; zx_ref[t] is a zero-cost leading-axis view.
        z = zx_ref[t].astype(jnp.float32) + jnp.dot(
            h.astype(cdtype), whh_vmem[...], preferred_element_type=jnp.float32)
        # PyTorch gate order [i, f, g, o]; slices are 128-lane aligned (H = H_pad).
        # sigmoid(x) = 0.5*(tanh(x/2)+1): one EUP op per gate instead of two.
        i_g = 0.5 * (jnp.tanh(0.5 * z[:, 0 * H:1 * H]) + 1.0)
        f_g = 0.5 * (jnp.tanh(0.5 * z[:, 1 * H:2 * H]) + 1.0)
        g_g = jnp.tanh(z[:, 2 * H:3 * H])
        o_g = 0.5 * (jnp.tanh(0.5 * z[:, 3 * H:4 * H]) + 1.0)
        c = f_g * c + i_g * g_g
        h = o_g * jnp.tanh(c)
        hs_ref[t] = h.astype(cdtype)
        return (h, c)

    # Bounded unroll: amortizes loop overhead without blowing the 64-vreg file.
    h, c = jax.lax.fori_loop(0, t_chunk, step, (h_ref[...], c_ref[...]),
                             unroll=max(1, math.gcd(t_chunk, 8)))
    h_ref[...] = h
    c_ref[...] = c

    # Fused output head for the whole chunk: one well-shaped MXU matmul, and the
    # hidden states never leave VMEM.
    hs = hs_ref[...].reshape(t_chunk * b_block, H)
    y = jnp.dot(hs, wout_ref[...], preferred_element_type=jnp.float32) + bout_ref[...]
    y_ref[...] = y.reshape(t_chunk, b_block, -1).astype(y_ref.dtype)


# --------------------------------------------------------------------------- #
# Host-side wrappers.
# --------------------------------------------------------------------------- #
def prepare_params(params, hidden_size, use_bf16=True):
    """One-time weight re-layout (hoisted out of the per-call forward):
    per-gate padding of the 4H axis to 128-lane boundaries (PyTorch gate order
    i, f, g, o), matmul-friendly transposition, optional bf16 cast of matmul
    operands (biases stay f32)."""
    w_ih, w_hh, b_ih, b_hh, w_out, b_out = params
    H = hidden_size
    I_in = w_ih.shape[1]
    P = w_out.shape[0]
    H_pad = _round_up(H, 128)
    P_pad = _round_up(P, 128)
    cdtype = jnp.bfloat16 if use_bf16 else jnp.float32

    w_ih_g = w_ih.reshape(4, H, I_in)
    w_hh_g = w_hh.reshape(4, H, H)
    b_g = (b_ih + b_hh).reshape(4, H)

    wih_t = jnp.zeros((I_in, 4 * H_pad), jnp.float32)
    whh_t = jnp.zeros((H_pad, 4 * H_pad), jnp.float32)
    bias = jnp.zeros((1, 4 * H_pad), jnp.float32)
    for g in range(4):
        wih_t = wih_t.at[:, g * H_pad:g * H_pad + H].set(w_ih_g[g].T)
        whh_t = whh_t.at[:H, g * H_pad:g * H_pad + H].set(w_hh_g[g].T)
        bias = bias.at[:, g * H_pad:g * H_pad + H].set(b_g[g])

    wout_t = jnp.zeros((H_pad, P_pad), jnp.float32).at[:H, :P].set(w_out.T)
    bout = jnp.zeros((1, P_pad), jnp.float32).at[:, :P].set(b_out)

    return (wih_t.astype(cdtype), whh_t.astype(cdtype), bias,
            wout_t.astype(cdtype), bout)


@functools.partial(jax.jit,
                   static_argnames=("num_providers", "t_chunk", "b_block"))
def lstm_forward(input_seq, prepared, num_providers, t_chunk=32, b_block=None):
    """input_seq: (B, T, I) f32 -> (B, T, num_providers) f32
    (== torch nn.LSTM(batch_first=True) with zero initial state + nn.Linear)."""
    B, T, I_in = input_seq.shape
    wih_t, whh_t, bias, wout_t, bout = prepared
    cdtype = whh_t.dtype
    H_pad = whh_t.shape[0]
    P_pad = wout_t.shape[1]
    P = num_providers

    if b_block is None:
        b_block = _pick_b_block(B)
    B_pad = _round_up(B, b_block)
    NB = B_pad // b_block
    t_chunk = max(1, min(t_chunk, T))
    T_pad = _round_up(T, t_chunk)
    NT = T_pad // t_chunk

    # Batch-block-major layout (NB, T_pad, b_block, .): every recurrence grid
    # block is one contiguous HBM segment (single large DMA descriptor).
    x = jnp.zeros((B_pad, T, I_in), jnp.float32).at[:B].set(input_seq)
    x = x.reshape(NB, b_block, T, I_in).transpose(0, 2, 1, 3)
    x = jnp.zeros((NB, T_pad, b_block, I_in), jnp.float32).at[:, :T].set(x)

    # Phase 1: hoisted input projection for all timesteps; zx stored in the
    # compute dtype (bf16 by default), halving the recurrence's dominant read.
    zx = _matmul_bias(x.reshape(NB * T_pad * b_block, I_in).astype(cdtype),
                      wih_t, bias, out_dtype=cdtype)
    zx = zx.reshape(NB, T_pad, b_block, 4 * H_pad)

    # Phase 2+3: sequential recurrence with fused Linear head.
    y = pl.pallas_call(
        _lstm_recurrence_kernel,
        out_shape=jax.ShapeDtypeStruct((NB, T_pad, b_block, P_pad), jnp.float32),
        grid=(NB, NT),  # time MUST stay innermost + "arbitrary".
        in_specs=[
            pl.BlockSpec((None, t_chunk, b_block, 4 * H_pad),
                         lambda nb, t: (nb, t, 0, 0)),
            pl.BlockSpec((H_pad, P_pad), lambda nb, t: (0, 0)),
            pl.BlockSpec((1, P_pad), lambda nb, t: (0, 0)),
            pl.BlockSpec(memory_space=pl.ANY),   # W_hh stays in HBM, staged once.
        ],
        out_specs=pl.BlockSpec((None, t_chunk, b_block, P_pad),
                               lambda nb, t: (nb, t, 0, 0)),
        scratch_shapes=[
            pltpu.VMEM((H_pad, 4 * H_pad), cdtype),         # staged W_hh (1 buffer)
            pltpu.VMEM((t_chunk, b_block, H_pad), cdtype),   # chunk hidden states
            pltpu.VMEM((b_block, H_pad), jnp.float32),       # h state (f32)
            pltpu.VMEM((b_block, H_pad), jnp.float32),       # c state (f32)
            pltpu.SemaphoreType.DMA(()),
        ],
        compiler_params=pltpu.CompilerParams(
            dimension_semantics=("parallel", "arbitrary"),
            vmem_limit_bytes=_VMEM_LIMIT_BYTES),
    )(zx, wout_t, bout, whh_t)

    # Back to (B, T, P).
    y = y.transpose(0, 2, 1, 3).reshape(B_pad, T_pad, P_pad)
    return y[:B, :T, :P]


def init_params(key, input_size, hidden_size, num_providers):
    """PyTorch-style uniform(-1/sqrt(H), 1/sqrt(H)) init."""
    k = 1.0 / jnp.sqrt(jnp.float32(hidden_size))
    keys = jax.random.split(key, 6)
    u = lambda kk, shape: jax.random.uniform(kk, shape, jnp.float32, -k, k)
    w_ih = u(keys[0], (4 * hidden_size, input_size))
    w_hh = u(keys[1], (4 * hidden_size, hidden_size))
    b_ih = u(keys[2], (4 * hidden_size,))
    b_hh = u(keys[3], (4 * hidden_size,))
    w_out = u(keys[4], (num_providers, hidden_size))
    b_out = u(keys[5], (num_providers,))
    return (w_ih, w_hh, b_ih, b_hh, w_out, b_out)


def lstm_forward_ref(input_seq, params, hidden_size):
    """Pure-JAX reference matching torch.nn.LSTM + nn.Linear semantics."""
    B, T, _ = input_seq.shape
    H = hidden_size
    w_ih, w_hh, b_ih, b_hh, w_out, b_out = params

    def step(carry, x_t):
        h, c = carry
        z = x_t @ w_ih.T + b_ih + h @ w_hh.T + b_hh
        i_g = jax.nn.sigmoid(z[:, 0 * H:1 * H])
        f_g = jax.nn.sigmoid(z[:, 1 * H:2 * H])
        g_g = jnp.tanh(z[:, 2 * H:3 * H])
        o_g = jax.nn.sigmoid(z[:, 3 * H:4 * H])
        c = f_g * c + i_g * g_g
        h = o_g * jnp.tanh(c)
        return (h, c), h

    h0 = jnp.zeros((B, H), jnp.float32)
    c0 = jnp.zeros((B, H), jnp.float32)
    _, hs = jax.lax.scan(step, (h0, c0), jnp.swapaxes(input_seq, 0, 1))
    lstm_out = jnp.swapaxes(hs, 0, 1)               # (B, T, H)
    return lstm_out @ w_out.T + b_out               # (B, T, P)


if __name__ == "__main__":
    B, T, I, H, P = 2, 8, 1, 32, 1

    key = jax.random.PRNGKey(0)
    k_x, k_p = jax.random.split(key)
    input_seq = jax.random.normal(k_x, (B, T, I), jnp.float32)
    params = init_params(k_p, I, H, P)

    ref = lstm_forward_ref(input_seq, params, H)

    # (a) Exact-parity f32 path; t_chunk=4 -> 2 time chunks, exercising the
    #     cross-chunk h/c persistence in VMEM scratch.
    prep_f32 = prepare_params(params, H, use_bf16=False)
    out_f32 = jax.block_until_ready(
        lstm_forward(input_seq, prep_f32, num_providers=P, t_chunk=4))
    assert out_f32.shape == (B, T, P), out_f32.shape
    assert jnp.allclose(out_f32, ref, atol=1e-4, rtol=1e-4), (
        float(jnp.max(jnp.abs(out_f32 - ref))))

    # (b) Default fast path: bf16 matmul operands, f32 accumulation/state.
    #     Looser tolerance (bf16 rounding); strict parity is checked above.
    prep_bf16 = prepare_params(params, H, use_bf16=True)
    out_bf16 = jax.block_until_ready(
        lstm_forward(input_seq, prep_bf16, num_providers=P))
    assert out_bf16.shape == (B, T, P), out_bf16.shape
    assert jnp.allclose(out_bf16, ref, atol=1e-1, rtol=1e-1), (
        float(jnp.max(jnp.abs(out_bf16 - ref))))

    print("KERNEL_OK")
</pallas_src>

<mosaic_0001>
module attributes {stable_mosaic.version = 11 : i64} {
  func.func @_matmul_bias_kernel(%arg0: i32, %arg1: i32, %arg2: memref<64x1xf32, #tpu.memory_space<vmem>>, %arg3: memref<1x512xf32, #tpu.memory_space<vmem>>, %arg4: memref<1x512xf32, #tpu.memory_space<vmem>>, %arg5: memref<64x512xf32, #tpu.memory_space<vmem>>) attributes {dimension_semantics = [#tpu.dimension_semantics<parallel>, #tpu.dimension_semantics<parallel>], iteration_bounds = array<i64: 1, 1>, scalar_prefetch = 0 : i64, scratch_operands = 0 : i64, tpu.core_type = #tpu.core_type<tc>, window_params = [{transform_indices = @transform_0, window_bounds = array<i64: 64, 1>}, {transform_indices = @transform_1, window_bounds = array<i64: 1, 512>}, {transform_indices = @transform_2, window_bounds = array<i64: 1, 512>}, {transform_indices = @transform_3, window_bounds = array<i64: 64, 512>}]} {
    %c0 = arith.constant 0 : index
    %c0_0 = arith.constant 0 : index
    %0 = vector.load %arg2[%c0, %c0_0] : memref<64x1xf32, #tpu.memory_space<vmem>>, vector<64x1xf32>
    %c0_1 = arith.constant 0 : index
    %c0_2 = arith.constant 0 : index
    %1 = vector.load %arg3[%c0_1, %c0_2] : memref<1x512xf32, #tpu.memory_space<vmem>>, vector<1x512xf32>
    %cst = arith.constant dense<0.000000e+00> : vector<64x512xf32>
    %2 = tpu.matmul %0, %1, %cst {dimension_numbers = #tpu.dot_dimension_numbers<[1], [0], [0], [1], [0, 0, 1, 1], [], []>} : vector<64x1xf32>, vector<1x512xf32>, vector<64x512xf32> -> vector<64x512xf32>
    %c0_3 = arith.constant 0 : index
    %c0_4 = arith.constant 0 : index
    %3 = vector.load %arg4[%c0_3, %c0_4] : memref<1x512xf32, #tpu.memory_space<vmem>>, vector<1x512xf32>
    %4 = vector.broadcast %3 : vector<1x512xf32> to vector<64x512xf32>
    %5 = arith.addf %2, %4 : vector<64x512xf32>
    %c0_5 = arith.constant 0 : index
    %c0_6 = arith.constant 0 : index
    %6 = vector.load %arg5[%c0_5, %c0_6] : memref<64x512xf32, #tpu.memory_space<vmem>>, vector<64x512xf32>
    tpu.vector_store %arg5[%c0_5, %c0_6], %5 {strides = array<i32>} : memref<64x512xf32, #tpu.memory_space<vmem>>, vector<64x512xf32>,
    return
  }
  func.func @transform_0(%arg0: i32, %arg1: i32) -> (i32, i32) {
    %c0_i32 = arith.constant 0 : i32
    %c0_i32_0 = arith.constant 0 : i32
    return %arg0, %c0_i32 : i32, i32
  }
  func.func @transform_1(%arg0: i32, %arg1: i32) -> (i32, i32) {
    %c0_i32 = arith.constant 0 : i32
    %c0_i32_0 = arith.constant 0 : i32
    return %c0_i32, %arg1 : i32, i32
  }
  func.func @transform_2(%arg0: i32, %arg1: i32) -> (i32, i32) {
    %c0_i32 = arith.constant 0 : i32
    %c0_i32_0 = arith.constant 0 : i32
    return %c0_i32, %arg1 : i32, i32
  }
  func.func @transform_3(%arg0: i32, %arg1: i32) -> (i32, i32) {
    %c0_i32 = arith.constant 0 : i32
    return %arg0, %arg1 : i32, i32
  }
}

module attributes {stable_mosaic.version = 11 : i64} {
  func.func @_lstm_recurrence_kernel(%arg0: i32, %arg1: i32, %arg2: memref<1x4x8x512xf32, #tpu.memory_space<vmem>>, %arg3: memref<128x128xf32, #tpu.memory_space<vmem>>, %arg4: memref<1x128xf32, #tpu.memory_space<vmem>>, %arg5: memref<128x512xf32, #tpu.memory_space<any>>, %arg6: memref<1x4x8x128xf32, #tpu.memory_space<vmem>>, %arg7: memref<128x512xf32, #tpu.memory_space<vmem>>, %arg8: memref<4x8x128xf32, #tpu.memory_space<vmem>>, %arg9: memref<8x128xf32, #tpu.memory_space<vmem>>, %arg10: memref<8x128xf32, #tpu.memory_space<vmem>>, %arg11: memref<!tpu.dma_semaphore, #tpu.memory_space<semaphore_mem>>) attributes {dimension_semantics = [#tpu.dimension_semantics<parallel>, #tpu.dimension_semantics<arbitrary>], iteration_bounds = array<i64: 1, 2>, scalar_prefetch = 0 : i64, scratch_operands = 5 : i64, tpu.core_type = #tpu.core_type<tc>, window_params = [{transform_indices = @transform_0, window_bounds = array<i64: 1, 4, 8, 512>}, {pipeline_mode = #tpu.pipeline_mode<synchronous>, transform_indices = @transform_1, window_bounds = array<i64: 128, 128>}, {pipeline_mode = #tpu.pipeline_mode<synchronous>, transform_indices = @transform_2, window_bounds = array<i64: 1, 128>}, {}, {transform_indices = @transform_4, window_bounds = array<i64: 1, 4, 8, 128>}]} {
    %c0_i32 = arith.constant 0 : i32
    %0 = arith.cmpi eq, %arg1, %c0_i32 : i32
    %1 = arith.extui %0 : i1 to i32
    %c0_i32_0 = arith.constant 0 : i32
    %2 = arith.cmpi ne, %1, %c0_i32_0 : i32
    scf.if %2 {
      tpu.enqueue_dma source(%arg5 : memref<128x512xf32, #tpu.memory_space<any>>) target(%arg7 : memref<128x512xf32, #tpu.memory_space<vmem>>) target_semaphore(%arg11 : memref<!tpu.dma_semaphore, #tpu.memory_space<semaphore_mem>>)
      tpu.wait_dma2 semaphore(%arg11 : memref<!tpu.dma_semaphore, #tpu.memory_space<semaphore_mem>>) src(%arg5 : memref<128x512xf32, #tpu.memory_space<any>>) dst(%arg7 : memref<128x512xf32, #tpu.memory_space<vmem>>)
      %cst_88 = arith.constant 0.000000e+00 : f32
      %182 = vector.broadcast %cst_88 : f32 to vector<8x128xf32>
      %c0_89 = arith.constant 0 : index
      %c0_90 = arith.constant 0 : index
      %183 = vector.load %arg9[%c0_89, %c0_90] : memref<8x128xf32, #tpu.memory_space<vmem>>, vector<8x128xf32>
      tpu.vector_store %arg9[%c0_89, %c0_90], %182 {strides = array<i32>} : memref<8x128xf32, #tpu.memory_space<vmem>>, vector<8x128xf32>,
      %cst_91 = arith.constant 0.000000e+00 : f32
      %184 = vector.broadcast %cst_91 : f32 to vector<8x128xf32>
      %c0_92 = arith.constant 0 : index
      %c0_93 = arith.constant 0 : index
      %185 = vector.load %arg10[%c0_92, %c0_93] : memref<8x128xf32, #tpu.memory_space<vmem>>, vector<8x128xf32>
      tpu.vector_store %arg10[%c0_92, %c0_93], %184 {strides = array<i32>} : memref<8x128xf32, #tpu.memory_space<vmem>>, vector<8x128xf32>,
    } else {
    }
    %c0 = arith.constant 0 : index
    %c0_1 = arith.constant 0 : index
    %3 = vector.load %arg9[%c0, %c0_1] : memref<8x128xf32, #tpu.memory_space<vmem>>, vector<8x128xf32>
    %c0_2 = arith.constant 0 : index
    %c0_3 = arith.constant 0 : index
    %4 = vector.load %arg10[%c0_2, %c0_3] : memref<8x128xf32, #tpu.memory_space<vmem>>, vector<8x128xf32>
    %c0_i32_4 = arith.constant 0 : i32
    %c0_5 = arith.constant 0 : index
    %5 = arith.index_cast %c0_i32_4 : i32 to index
    %c0_6 = arith.constant 0 : index
    %c0_7 = arith.constant 0 : index
    %6 = vector.load %arg2[%c0_5, %5, %c0_6, %c0_7] : memref<1x4x8x512xf32, #tpu.memory_space<vmem>>, vector<1x1x8x512xf32>
    %7 = vector.shape_cast %6 : vector<1x1x8x512xf32> to vector<8x512xf32>
    %c0_8 = arith.constant 0 : index
    %c0_9 = arith.constant 0 : index
    %8 = vector.load %arg7[%c0_8, %c0_9] : memref<128x512xf32, #tpu.memory_space<vmem>>, vector<128x512xf32>
    %cst = arith.constant dense<0.000000e+00> : vector<8x512xf32>
    %9 = tpu.matmul %3, %8, %cst {dimension_numbers = #tpu.dot_dimension_numbers<[1], [0], [0], [1], [0, 0, 1, 1], [], []>} : vector<8x128xf32>, vector<128x512xf32>, vector<8x512xf32> -> vector<8x512xf32>
    %10 = arith.addf %7, %9 : vector<8x512xf32>
    %11 = vector.extract_strided_slice %10 {offsets = [0, 0], sizes = [8, 128], strides = [1, 1]} : vector<8x512xf32> to vector<8x128xf32>
    %cst_10 = arith.constant 5.000000e-01 : f32
    %12 = vector.broadcast %cst_10 : f32 to vector<8x128xf32>
    %13 = arith.mulf %12, %11 : vector<8x128xf32>
    %14 = math.tanh %13 : vector<8x128xf32>
    %cst_11 = arith.constant 1.000000e+00 : f32
    %15 = vector.broadcast %cst_11 : f32 to vector<8x128xf32>
    %16 = arith.addf %14, %15 : vector<8x128xf32>
    %cst_12 = arith.constant 5.000000e-01 : f32
    %17 = vector.broadcast %cst_12 : f32 to vector<8x128xf32>
    %18 = arith.mulf %17, %16 : vector<8x128xf32>
    %19 = vector.extract_strided_slice %10 {offsets = [0, 128], sizes = [8, 128], strides = [1, 1]} : vector<8x512xf32> to vector<8x128xf32>
    %cst_13 = arith.constant 5.000000e-01 : f32
    %20 = vector.broadcast %cst_13 : f32 to vector<8x128xf32>
    %21 = arith.mulf %20, %19 : vector<8x128xf32>
    %22 = math.tanh %21 : vector<8x128xf32>
    %cst_14 = arith.constant 1.000000e+00 : f32
    %23 = vector.broadcast %cst_14 : f32 to vector<8x128xf32>
    %24 = arith.addf %22, %23 : vector<8x128xf32>
    %cst_15 = arith.constant 5.000000e-01 : f32
    %25 = vector.broadcast %cst_15 : f32 to vector<8x128xf32>
    %26 = arith.mulf %25, %24 : vector<8x128xf32>
    %27 = vector.extract_strided_slice %10 {offsets = [0, 256], sizes = [8, 128], strides = [1, 1]} : vector<8x512xf32> to vector<8x128xf32>
    %28 = math.tanh %27 : vector<8x128xf32>
    %29 = vector.extract_strided_slice %10 {offsets = [0, 384], sizes = [8, 128], strides = [1, 1]} : vector<8x512xf32> to vector<8x128xf32>
    %cst_16 = arith.constant 5.000000e-01 : f32
    %30 = vector.broadcast %cst_16 : f32 to vector<8x128xf32>
    %31 = arith.mulf %30, %29 : vector<8x128xf32>
    %32 = math.tanh %31 : vector<8x128xf32>
    %cst_17 = arith.constant 1.000000e+00 : f32
    %33 = vector.broadcast %cst_17 : f32 to vector<8x128xf32>
    %34 = arith.addf %32, %33 : vector<8x128xf32>
    %cst_18 = arith.constant 5.000000e-01 : f32
    %35 = vector.broadcast %cst_18 : f32 to vector<8x128xf32>
    %36 = arith.mulf %35, %34 : vector<8x128xf32>
    %37 = arith.mulf %26, %4 : vector<8x128xf32>
    %38 = arith.mulf %18, %28 : vector<8x128xf32>
    %39 = arith.addf %37, %38 : vector<8x128xf32>
    %40 = math.tanh %39 : vector<8x128xf32>
    %41 = arith.mulf %36, %40 : vector<8x128xf32>
    %42 = arith.index_cast %c0_i32_4 : i32 to index
    %c0_19 = arith.constant 0 : index
    %c0_20 = arith.constant 0 : index
    %43 = vector.load %arg8[%42, %c0_19, %c0_20] : memref<4x8x128xf32, #tpu.memory_space<vmem>>, vector<1x8x128xf32>
    %44 = vector.shape_cast %43 : vector<1x8x128xf32> to vector<8x128xf32>
    %45 = vector.shape_cast %41 : vector<8x128xf32> to vector<1x8x128xf32>
    tpu.vector_store %arg8[%42, %c0_19, %c0_20], %45 {strides = array<i32>} : memref<4x8x128xf32, #tpu.memory_space<vmem>>, vector<1x8x128xf32>,
    %c1_i32 = arith.constant 1 : i32
    %c0_21 = arith.constant 0 : index
    %46 = arith.index_cast %c1_i32 : i32 to index
    %c0_22 = arith.constant 0 : index
    %c0_23 = arith.constant 0 : index
    %47 = vector.load %arg2[%c0_21, %46, %c0_22, %c0_23] : memref<1x4x8x512xf32, #tpu.memory_space<vmem>>, vector<1x1x8x512xf32>
    %48 = vector.shape_cast %47 : vector<1x1x8x512xf32> to vector<8x512xf32>
    %c0_24 = arith.constant 0 : index
    %c0_25 = arith.constant 0 : index
    %49 = vector.load %arg7[%c0_24, %c0_25] : memref<128x512xf32, #tpu.memory_space<vmem>>, vector<128x512xf32>
    %cst_26 = arith.constant dense<0.000000e+00> : vector<8x512xf32>
    %50 = tpu.matmul %41, %49, %cst_26 {dimension_numbers = #tpu.dot_dimension_numbers<[1], [0], [0], [1], [0, 0, 1, 1], [], []>} : vector<8x128xf32>, vector<128x512xf32>, vector<8x512xf32> -> vector<8x512xf32>
    %51 = arith.addf %48, %50 : vector<8x512xf32>
    %52 = vector.extract_strided_slice %51 {offsets = [0, 0], sizes = [8, 128], strides = [1, 1]} : vector<8x512xf32> to vector<8x128xf32>
    %cst_27 = arith.constant 5.000000e-01 : f32
    %53 = vector.broadcast %cst_27 : f32 to vector<8x128xf32>
    %54 = arith.mulf %53, %52 : vector<8x128xf32>
    %55 = math.tanh %54 : vector<8x128xf32>
    %cst_28 = arith.constant 1.000000e+00 : f32
    %56 = vector.broadcast %cst_28 : f32 to vector<8x128xf32>
    %57 = arith.addf %55, %56 : vector<8x128xf32>
    %cst_29 = arith.constant 5.000000e-01 : f32
    %58 = vector.broadcast %cst_29 : f32 to vector<8x128xf32>
    %59 = arith.mulf %58, %57 : vector<8x128xf32>
    %60 = vector.extract_strided_slice %51 {offsets = [0, 128], sizes = [8, 128], strides = [1, 1]} : vector<8x512xf32> to vector<8x128xf32>
    %cst_30 = arith.constant 5.000000e-01 : f32
    %61 = vector.broadcast %cst_30 : f32 to vector<8x128xf32>
    %62 = arith.mulf %61, %60 : vector<8x128xf32>
    %63 = math.tanh %62 : vector<8x128xf32>
    %cst_31 = arith.constant 1.000000e+00 : f32
    %64 = vector.broadcast %cst_31 : f32 to vector<8x128xf32>
    %65 = arith.addf %63, %64 : vector<8x128xf32>
    %cst_32 = arith.constant 5.000000e-01 : f32
    %66 = vector.broadcast %cst_32 : f32 to vector<8x128xf32>
    %67 = arith.mulf %66, %65 : vector<8x128xf32>
    %68 = vector.extract_strided_slice %51 {offsets = [0, 256], sizes = [8, 128], strides = [1, 1]} : vector<8x512xf32> to vector<8x128xf32>
    %69 = math.tanh %68 : vector<8x128xf32>
    %70 = vector.extract_strided_slice %51 {offsets = [0, 384], sizes = [8, 128], strides = [1, 1]} : vector<8x512xf32> to vector<8x128xf32>
    %cst_33 = arith.constant 5.000000e-01 : f32
    %71 = vector.broadcast %cst_33 : f32 to vector<8x128xf32>
    %72 = arith.mulf %71, %70 : vector<8x128xf32>
    %73 = math.tanh %72 : vector<8x128xf32>
    %cst_34 = arith.constant 1.000000e+00 : f32
    %74 = vector.broadcast %cst_34 : f32 to vector<8x128xf32>
    %75 = arith.addf %73, %74 : vector<8x128xf32>
    %cst_35 = arith.constant 5.000000e-01 : f32
    %76 = vector.broadcast %cst_35 : f32 to vector<8x128xf32>
    %77 = arith.mulf %76, %75 : vector<8x128xf32>
    %78 = arith.mulf %67, %39 : vector<8x128xf32>
    %79 = arith.mulf %59, %69 : vector<8x128xf32>
    %80 = arith.addf %78, %79 : vector<8x128xf32>
    %81 = math.tanh %80 : vector<8x128xf32>
    %82 = arith.mulf %77, %81 : vector<8x128xf32>
    %83 = arith.index_cast %c1_i32 : i32 to index
    %c0_36 = arith.constant 0 : index
    %c0_37 = arith.constant 0 : index
    %84 = vector.load %arg8[%83, %c0_36, %c0_37] : memref<4x8x128xf32, #tpu.memory_space<vmem>>, vector<1x8x128xf32>
    %85 = vector.shape_cast %84 : vector<1x8x128xf32> to vector<8x128xf32>
    %86 = vector.shape_cast %82 : vector<8x128xf32> to vector<1x8x128xf32>
    tpu.vector_store %arg8[%83, %c0_36, %c0_37], %86 {strides = array<i32>} : memref<4x8x128xf32, #tpu.memory_space<vmem>>, vector<1x8x128xf32>,
    %c2_i32 = arith.constant 2 : i32
    %c0_38 = arith.constant 0 : index
    %87 = arith.index_cast %c2_i32 : i32 to index
    %c0_39 = arith.constant 0 : index
    %c0_40 = arith.constant 0 : index
    %88 = vector.load %arg2[%c0_38, %87, %c0_39, %c0_40] : memref<1x4x8x512xf32, #tpu.memory_space<vmem>>, vector<1x1x8x512xf32>
    %89 = vector.shape_cast %88 : vector<1x1x8x512xf32> to vector<8x512xf32>
    %c0_41 = arith.constant 0 : index
    %c0_42 = arith.constant 0 : index
    %90 = vector.load %arg7[%c0_41, %c0_42] : memref<128x512xf32, #tpu.memory_space<vmem>>, vector<128x512xf32>
    %cst_43 = arith.constant dense<0.000000e+00> : vector<8x512xf32>
    %91 = tpu.matmul %82, %90, %cst_43 {dimension_numbers = #tpu.dot_dimension_numbers<[1], [0], [0], [1], [0, 0, 1, 1], [], []>} : vector<8x128xf32>, vector<128x512xf32>, vector<8x512xf32> -> vector<8x512xf32>
    %92 = arith.addf %89, %91 : vector<8x512xf32>
    %93 = vector.extract_strided_slice %92 {offsets = [0, 0], sizes = [8, 128], strides = [1, 1]} : vector<8x512xf32> to vector<8x128xf32>
    %cst_44 = arith.constant 5.000000e-01 : f32
    %94 = vector.broadcast %cst_44 : f32 to vector<8x128xf32>
    %95 = arith.mulf %94, %93 : vector<8x128xf32>
    %96 = math.tanh %95 : vector<8x128xf32>
    %cst_45 = arith.constant 1.000000e+00 : f32
    %97 = vector.broadcast %cst_45 : f32 to vector<8x128xf32>
    %98 = arith.addf %96, %97 : vector<8x128xf32>
    %cst_46 = arith.constant 5.000000e-01 : f32
    %99 = vector.broadcast %cst_46 : f32 to vector<8x128xf32>
    %100 = arith.mulf %99, %98 : vector<8x128xf32>
    %101 = vector.extract_strided_slice %92 {offsets = [0, 128], sizes = [8, 128], strides = [1, 1]} : vector<8x512xf32> to vector<8x128xf32>
    %cst_47 = arith.constant 5.000000e-01 : f32
    %102 = vector.broadcast %cst_47 : f32 to vector<8x128xf32>
    %103 = arith.mulf %102, %101 : vector<8x128xf32>
    %104 = math.tanh %103 : vector<8x128xf32>
    %cst_48 = arith.constant 1.000000e+00 : f32
    %105 = vector.broadcast %cst_48 : f32 to vector<8x128xf32>
    %106 = arith.addf %104, %105 : vector<8x128xf32>
    %cst_49 = arith.constant 5.000000e-01 : f32
    %107 = vector.broadcast %cst_49 : f32 to vector<8x128xf32>
    %108 = arith.mulf %107, %106 : vector<8x128xf32>
    %109 = vector.extract_strided_slice %92 {offsets = [0, 256], sizes = [8, 128], strides = [1, 1]} : vector<8x512xf32> to vector<8x128xf32>
    %110 = math.tanh %109 : vector<8x128xf32>
    %111 = vector.extract_strided_slice %92 {offsets = [0, 384], sizes = [8, 128], strides = [1, 1]} : vector<8x512xf32> to vector<8x128xf32>
    %cst_50 = arith.constant 5.000000e-01 : f32
    %112 = vector.broadcast %cst_50 : f32 to vector<8x128xf32>
    %113 = arith.mulf %112, %111 : vector<8x128xf32>
    %114 = math.tanh %113 : vector<8x128xf32>
    %cst_51 = arith.constant 1.000000e+00 : f32
    %115 = vector.broadcast %cst_51 : f32 to vector<8x128xf32>
    %116 = arith.addf %114, %115 : vector<8x128xf32>
    %cst_52 = arith.constant 5.000000e-01 : f32
    %117 = vector.broadcast %cst_52 : f32 to vector<8x128xf32>
    %118 = arith.mulf %117, %116 : vector<8x128xf32>
    %119 = arith.mulf %108, %80 : vector<8x128xf32>
    %120 = arith.mulf %100, %110 : vector<8x128xf32>
    %121 = arith.addf %119, %120 : vector<8x128xf32>
    %122 = math.tanh %121 : vector<8x128xf32>
    %123 = arith.mulf %118, %122 : vector<8x128xf32>
    %124 = arith.index_cast %c2_i32 : i32 to index
    %c0_53 = arith.constant 0 : index
    %c0_54 = arith.constant 0 : index
    %125 = vector.load %arg8[%124, %c0_53, %c0_54] : memref<4x8x128xf32, #tpu.memory_space<vmem>>, vector<1x8x128xf32>
    %126 = vector.shape_cast %125 : vector<1x8x128xf32> to vector<8x128xf32>
    %127 = vector.shape_cast %123 : vector<8x128xf32> to vector<1x8x128xf32>
    tpu.vector_store %arg8[%124, %c0_53, %c0_54], %127 {strides = array<i32>} : memref<4x8x128xf32, #tpu.memory_space<vmem>>, vector<1x8x128xf32>,
    %c3_i32 = arith.constant 3 : i32
    %c0_55 = arith.constant 0 : index
    %128 = arith.index_cast %c3_i32 : i32 to index
    %c0_56 = arith.constant 0 : index
    %c0_57 = arith.constant 0 : index
    %129 = vector.load %arg2[%c0_55, %128, %c0_56, %c0_57] : memref<1x4x8x512xf32, #tpu.memory_space<vmem>>, vector<1x1x8x512xf32>
    %130 = vector.shape_cast %129 : vector<1x1x8x512xf32> to vector<8x512xf32>
    %c0_58 = arith.constant 0 : index
    %c0_59 = arith.constant 0 : index
    %131 = vector.load %arg7[%c0_58, %c0_59] : memref<128x512xf32, #tpu.memory_space<vmem>>, vector<128x512xf32>
    %cst_60 = arith.constant dense<0.000000e+00> : vector<8x512xf32>
    %132 = tpu.matmul %123, %131, %cst_60 {dimension_numbers = #tpu.dot_dimension_numbers<[1], [0], [0], [1], [0, 0, 1, 1], [], []>} : vector<8x128xf32>, vector<128x512xf32>, vector<8x512xf32> -> vector<8x512xf32>
    %133 = arith.addf %130, %132 : vector<8x512xf32>
    %134 = vector.extract_strided_slice %133 {offsets = [0, 0], sizes = [8, 128], strides = [1, 1]} : vector<8x512xf32> to vector<8x128xf32>
    %cst_61 = arith.constant 5.000000e-01 : f32
    %135 = vector.broadcast %cst_61 : f32 to vector<8x128xf32>
    %136 = arith.mulf %135, %134 : vector<8x128xf32>
    %137 = math.tanh %136 : vector<8x128xf32>
    %cst_62 = arith.constant 1.000000e+00 : f32
    %138 = vector.broadcast %cst_62 : f32 to vector<8x128xf32>
    %139 = arith.addf %137, %138 : vector<8x128xf32>
    %cst_63 = arith.constant 5.000000e-01 : f32
    %140 = vector.broadcast %cst_63 : f32 to vector<8x128xf32>
    %141 = arith.mulf %140, %139 : vector<8x128xf32>
    %142 = vector.extract_strided_slice %133 {offsets = [0, 128], sizes = [8, 128], strides = [1, 1]} : vector<8x512xf32> to vector<8x128xf32>
    %cst_64 = arith.constant 5.000000e-01 : f32
    %143 = vector.broadcast %cst_64 : f32 to vector<8x128xf32>
    %144 = arith.mulf %143, %142 : vector<8x128xf32>
    %145 = math.tanh %144 : vector<8x128xf32>
    %cst_65 = arith.constant 1.000000e+00 : f32
    %146 = vector.broadcast %cst_65 : f32 to vector<8x128xf32>
    %147 = arith.addf %145, %146 : vector<8x128xf32>
    %cst_66 = arith.constant 5.000000e-01 : f32
    %148 = vector.broadcast %cst_66 : f32 to vector<8x128xf32>
    %149 = arith.mulf %148, %147 : vector<8x128xf32>
    %150 = vector.extract_strided_slice %133 {offsets = [0, 256], sizes = [8, 128], strides = [1, 1]} : vector<8x512xf32> to vector<8x128xf32>
    %151 = math.tanh %150 : vector<8x128xf32>
    %152 = vector.extract_strided_slice %133 {offsets = [0, 384], sizes = [8, 128], strides = [1, 1]} : vector<8x512xf32> to vector<8x128xf32>
    %cst_67 = arith.constant 5.000000e-01 : f32
    %153 = vector.broadcast %cst_67 : f32 to vector<8x128xf32>
    %154 = arith.mulf %153, %152 : vector<8x128xf32>
    %155 = math.tanh %154 : vector<8x128xf32>
    %cst_68 = arith.constant 1.000000e+00 : f32
    %156 = vector.broadcast %cst_68 : f32 to vector<8x128xf32>
    %157 = arith.addf %155, %156 : vector<8x128xf32>
    %cst_69 = arith.constant 5.000000e-01 : f32
    %158 = vector.broadcast %cst_69 : f32 to vector<8x128xf32>
    %159 = arith.mulf %158, %157 : vector<8x128xf32>
    %160 = arith.mulf %149, %121 : vector<8x128xf32>
    %161 = arith.mulf %141, %151 : vector<8x128xf32>
    %162 = arith.addf %160, %161 : vector<8x128xf32>
    %163 = math.tanh %162 : vector<8x128xf32>
    %164 = arith.mulf %159, %163 : vector<8x128xf32>
    %165 = arith.index_cast %c3_i32 : i32 to index
    %c0_70 = arith.constant 0 : index
    %c0_71 = arith.constant 0 : index
    %166 = vector.load %arg8[%165, %c0_70, %c0_71] : memref<4x8x128xf32, #tpu.memory_space<vmem>>, vector<1x8x128xf32>
    %167 = vector.shape_cast %166 : vector<1x8x128xf32> to vector<8x128xf32>
    %168 = vector.shape_cast %164 : vector<8x128xf32> to vector<1x8x128xf32>
    tpu.vector_store %arg8[%165, %c0_70, %c0_71], %168 {strides = array<i32>} : memref<4x8x128xf32, #tpu.memory_space<vmem>>, vector<1x8x128xf32>,
    %c4_i32 = arith.constant 4 : i32
    %c0_72 = arith.constant 0 : index
    %c0_73 = arith.constant 0 : index
    %169 = vector.load %arg9[%c0_72, %c0_73] : memref<8x128xf32, #tpu.memory_space<vmem>>, vector<8x128xf32>
    tpu.vector_store %arg9[%c0_72, %c0_73], %164 {strides = array<i32>} : memref<8x128xf32, #tpu.memory_space<vmem>>, vector<8x128xf32>,
    %c0_74 = arith.constant 0 : index
    %c0_75 = arith.constant 0 : index
    %170 = vector.load %arg10[%c0_74, %c0_75] : memref<8x128xf32, #tpu.memory_space<vmem>>, vector<8x128xf32>
    tpu.vector_store %arg10[%c0_74, %c0_75], %162 {strides = array<i32>} : memref<8x128xf32, #tpu.memory_space<vmem>>, vector<8x128xf32>,
    %c0_76 = arith.constant 0 : index
    %c0_77 = arith.constant 0 : index
    %c0_78 = arith.constant 0 : index
    %171 = vector.load %arg8[%c0_76, %c0_77, %c0_78] : memref<4x8x128xf32, #tpu.memory_space<vmem>>, vector<4x8x128xf32>
    %172 = vector.shape_cast %171 : vector<4x8x128xf32> to vector<32x128xf32>
    %c0_79 = arith.constant 0 : index
    %c0_80 = arith.constant 0 : index
    %173 = vector.load %arg3[%c0_79, %c0_80] : memref<128x128xf32, #tpu.memory_space<vmem>>, vector<128x128xf32>
    %cst_81 = arith.constant dense<0.000000e+00> : vector<32x128xf32>
    %174 = tpu.matmul %172, %173, %cst_81 {dimension_numbers = #tpu.dot_dimension_numbers<[1], [0], [0], [1], [0, 0, 1, 1], [], []>} : vector<32x128xf32>, vector<128x128xf32>, vector<32x128xf32> -> vector<32x128xf32>
    %c0_82 = arith.constant 0 : index
    %c0_83 = arith.constant 0 : index
    %175 = vector.load %arg4[%c0_82, %c0_83] : memref<1x128xf32, #tpu.memory_space<vmem>>, vector<1x128xf32>
    %176 = vector.broadcast %175 : vector<1x128xf32> to vector<32x128xf32>
    %177 = arith.addf %174, %176 : vector<32x128xf32>
    %178 = vector.shape_cast %177 : vector<32x128xf32> to vector<4x8x128xf32>
    %c0_84 = arith.constant 0 : index
    %c0_85 = arith.constant 0 : index
    %c0_86 = arith.constant 0 : index
    %c0_87 = arith.constant 0 : index
    %179 = vector.load %arg6[%c0_84, %c0_85, %c0_86, %c0_87] : memref<1x4x8x128xf32, #tpu.memory_space<vmem>>, vector<1x4x8x128xf32>
    %180 = vector.shape_cast %179 : vector<1x4x8x128xf32> to vector<4x8x128xf32>
    %181 = vector.shape_cast %178 : vector<4x8x128xf32> to vector<1x4x8x128xf32>
    tpu.vector_store %arg6[%c0_84, %c0_85, %c0_86, %c0_87], %181 {strides = array<i32>} : memref<1x4x8x128xf32, #tpu.memory_space<vmem>>, vector<1x4x8x128xf32>,
    return
  }
  func.func @transform_0(%arg0: i32, %arg1: i32) -> (i32, i32, i32, i32) {
    %c0_i32 = arith.constant 0 : i32
    %c0_i32_0 = arith.constant 0 : i32
    %c0_i32_1 = arith.constant 0 : i32
    return %arg0, %arg1, %c0_i32, %c0_i32_0 : i32, i32, i32, i32
  }
  func.func @transform_1(%arg0: i32, %arg1: i32) -> (i32, i32) {
    %c0_i32 = arith.constant 0 : i32
    %c0_i32_0 = arith.constant 0 : i32
    %c0_i32_1 = arith.constant 0 : i32
    return %c0_i32, %c0_i32_0 : i32, i32
  }
  func.func @transform_2(%arg0: i32, %arg1: i32) -> (i32, i32) {
    %c0_i32 = arith.constant 0 : i32
    %c0_i32_0 = arith.constant 0 : i32
    %c0_i32_1 = arith.constant 0 : i32
    return %c0_i32, %c0_i32_0 : i32, i32
  }
  func.func @transform_4(%arg0: i32, %arg1: i32) -> (i32, i32, i32, i32) {
    %c0_i32 = arith.constant 0 : i32
    %c0_i32_0 = arith.constant 0 : i32
    %c0_i32_1 = arith.constant 0 : i32
    return %arg0, %arg1, %c0_i32, %c0_i32_0 : i32, i32, i32, i32
  }
}

</mosaic_0001>

<bundles_post_ra>
// kernel: lstm_forward.2
= control target key start
LH: loop header
LB: loop body
LE: loop exit
PB: predicated region body
PF: predicated region fallthrough
CT: control target
= control target key end

     0   :  { %v25_v0 = vlaneseq  ;;  %v379_v1 = vmov 0.0   ;;  %vm87_vm0 = vcmask 1040384   ;;  %vm62_vm1 = vcmask 7168   ;;  %s582_s1 = inlined_call_operand.vmem [shape: f32[1,512], index: 1, kind: input, shape index: {}]   ;;  %s583_s0 = inlined_call_operand.vmem [shape: f32[64,1], index: 0, kind: input, shape index: {}]   ;;  %s584_s2 = inlined_call_operand.vmem [shape: f32[1,512], index: 2, kind: input, shape index: {}]   ;;  %s585_s3 = inlined_call_operand.vmem [shape: f32[64,512], index: 3, kind: output, shape index: {}]  }
   0x1   :  { %160 = vmatprep.mubr.f32.mxu0 %v379_v1  ;;  %273 = vmatprep.mubr.f32.mxu1 %v379_v1  ;;  %v22_v3 = vld [vmem:[%s582_s1] sm:$0xf]  ;;  %v15_v13 = vld [vmem:[%s583_s0 + $0x8] sm:$0xff]  ;;  %v16_v14 = vld [vmem:[%s583_s0 + $0x10] sm:$0xff] }
   0x2   :  { %v26_v2 = vshrl.u32 %v25_v0, 7  ;;  %v14_v12 = vld [vmem:[%s583_s0] sm:$0xff]  ;;  %v17_v15 = vld [vmem:[%s583_s0 + $0x18] sm:$0xff]  ;;  %v19_v17 = vld [vmem:[%s583_s0 + $0x28] sm:$0xff] }
   0x3   :  { %v18_v16 = vld [vmem:[%s583_s0 + $0x20] sm:$0xff]  ;;  %v20_v18 = vld [vmem:[%s583_s0 + $0x30] sm:$0xff]  ;;  %v21_v19 = vld [vmem:[%s583_s0 + $0x38] sm:$0xff] }
   0x4   :  { %v31_v4 = vsub.s32 1, %v26_v2  ;;  %v39_v5 = vsub.s32 3, %v26_v2  ;;  %v27_v6 = vsub.s32 0, %v26_v2  ;;  %v35_v7 = vsub.s32 2, %v26_v2  ;;  %v23_v20 = vld [vmem:[%s584_s2] sm:$0xf] }
   0x6   :  { %v53_v8 = vrot.slane %v22_v3, %v31_v4  ;;  %v61_v9 = vrot.slane %v22_v3, %v39_v5  ;;  %v49_v10 = vrot.slane %v22_v3, %v27_v6  ;;  %v57_v11 = vrot.slane %v22_v3, %v35_v7 }
   0x7   :  { %v446_v21 = vrot.slane %v23_v20, %v27_v6  ;;  %v448_v22 = vrot.slane %v23_v20, %v35_v7  ;;  %v450_v23 = vrot.slane %v23_v20, %v31_v4  ;;  %v452_v24 = vrot.slane %v23_v20, %v39_v5 }
   0x8   :  { %358 = vmatprep.subr.msk.mxu0 %vm87_vm0, %v53_v8  ;;  %368 = vmatprep.subr.msk.mxu1 %vm87_vm0, %v61_v9 }
   0x9   :  { %359 = vmatpush1.msk.msra.mxu0 %vm87_vm0, %v49_v10  ;;  %369 = vmatpush1.msk.msra.mxu1 %vm87_vm0, %v57_v11 }
   0xa   :  { %360 = vmatmul.mubr.msk.f32.vlgmr.msra.gmra.mxu0 %vm62_vm1, %v14_v12  ;;  %370 = vmatmul.mubr.msk.f32.vlgmr.msra.gmra.mxu1 %vm62_vm1, %v14_v12 }
   0xb   :  { %166 = vmatprep.mubr.f32.mxu0 %v379_v1  ;;  %279 = vmatprep.mubr.f32.mxu1 %v379_v1 }
   0xe   :  { %361 = vmatmul.mubr.msk.f32.gmra.mxu0 %vm62_vm1, %v15_v13  ;;  %371 = vmatmul.mubr.msk.f32.gmra.mxu1 %vm62_vm1, %v15_v13 }
   0xf   :  { %172 = vmatprep.mubr.f32.mxu0 %v379_v1  ;;  %285 = vmatprep.mubr.f32.mxu1 %v379_v1 }
  0x12   :  { %362 = vmatmul.mubr.msk.f32.gmra.mxu0 %vm62_vm1, %v16_v14  ;;  %372 = vmatmul.mubr.msk.f32.gmra.mxu1 %vm62_vm1, %v16_v14 }
  0x13   :  { %178 = vmatprep.mubr.f32.mxu0 %v379_v1  ;;  %291 = vmatprep.mubr.f32.mxu1 %v379_v1 }
  0x16   :  { %363 = vmatmul.mubr.msk.f32.gmra.mxu0 %vm62_vm1, %v17_v15  ;;  %373 = vmatmul.mubr.msk.f32.gmra.mxu1 %vm62_vm1, %v17_v15 }
  0x17   :  { %184 = vmatprep.mubr.f32.mxu0 %v379_v1  ;;  %297 = vmatprep.mubr.f32.mxu1 %v379_v1 }
  0x1a   :  { %364 = vmatmul.mubr.msk.f32.gmra.mxu0 %vm62_vm1, %v18_v16  ;;  %374 = vmatmul.mubr.msk.f32.gmra.mxu1 %vm62_vm1, %v18_v16 }
  0x1b   :  { %190 = vmatprep.mubr.f32.mxu0 %v379_v1  ;;  %303 = vmatprep.mubr.f32.mxu1 %v379_v1 }
  0x1e   :  { %365 = vmatmul.mubr.msk.f32.gmra.mxu0 %vm62_vm1, %v19_v17  ;;  %375 = vmatmul.mubr.msk.f32.gmra.mxu1 %vm62_vm1, %v19_v17 }
  0x1f   :  { %196 = vmatprep.mubr.f32.mxu0 %v379_v1  ;;  %309 = vmatprep.mubr.f32.mxu1 %v379_v1 }
  0x22   :  { %366 = vmatmul.mubr.msk.f32.gmra.mxu0 %vm62_vm1, %v20_v18  ;;  %376 = vmatmul.mubr.msk.f32.gmra.mxu1 %vm62_vm1, %v20_v18 }
  0x23   :  { %202 = vmatprep.mubr.f32.mxu0 %v379_v1  ;;  %315 = vmatprep.mubr.f32.mxu1 %v379_v1 }
  0x26   :  { %367 = vmatmul.mubr.msk.f32.gmra.mxu0 %vm62_vm1, %v21_v19  ;;  %377 = vmatmul.mubr.msk.f32.gmra.mxu1 %vm62_vm1, %v21_v19 }
  0xca   :  { %v162_v25 = vpop.f32.mrf.mxu0  ;;  %v275_v26 = vpop.f32.mrf.mxu1 }
  0xcb   :  { %v163_v27 = vadd.f32 %v162_v25, %v446_v21  ;;  %v276_v28 = vadd.f32 %v275_v26, %v448_v22 }
  0xcc   :  { %v164_v29 = vpop.f32.mrf.mxu0  ;;  %v277_v30 = vpop.f32.mrf.mxu1 }
  0xcd   :  { %322 = vst [vmem:[%s585_s3] sm:$0xff] %v163_v27  ;;  %324 = vst [vmem:[%s585_s3 + $0x10] sm:$0xff] %v276_v28  ;;  %v165_v31 = vadd.f32 %v164_v29, %v450_v23  ;;  %v278_v32 = vadd.f32 %v277_v30, %v452_v24 }
  0xce   :  { %v168_v33 = vpop.f32.mrf.mxu0  ;;  %v281_v34 = vpop.f32.mrf.mxu1 }
  0xcf   :  { %323 = vst [vmem:[%s585_s3 + $0x8] sm:$0xff] %v165_v31  ;;  %325 = vst [vmem:[%s585_s3 + $0x18] sm:$0xff] %v278_v32  ;;  %v169_v35 = vadd.f32 %v168_v33, %v446_v21  ;;  %v282_v36 = vadd.f32 %v281_v34, %v448_v22 }
  0xd0   :  { %v170_v37 = vpop.f32.mrf.mxu0  ;;  %v283_v38 = vpop.f32.mrf.mxu1 }
  0xd1   :  { %326 = vst [vmem:[%s585_s3 + $0x20] sm:$0xff] %v169_v35  ;;  %328 = vst [vmem:[%s585_s3 + $0x30] sm:$0xff] %v282_v36  ;;  %v171_v39 = vadd.f32 %v170_v37, %v450_v23  ;;  %v284_v40 = vadd.f32 %v283_v38, %v452_v24 }
  0xd2   :  { %v174_v41 = vpop.f32.mrf.mxu0  ;;  %v287_v42 = vpop.f32.mrf.mxu1 }
  0xd3   :  { %327 = vst [vmem:[%s585_s3 + $0x28] sm:$0xff] %v171_v39  ;;  %329 = vst [vmem:[%s585_s3 + $0x38] sm:$0xff] %v284_v40  ;;  %v175_v43 = vadd.f32 %v174_v41, %v446_v21  ;;  %v288_v44 = vadd.f32 %v287_v42, %v448_v22 }
  0xd4   :  { %v176_v45 = vpop.f32.mrf.mxu0  ;;  %v289_v46 = vpop.f32.mrf.mxu1 }
  0xd5   :  { %330 = vst [vmem:[%s585_s3 + $0x40] sm:$0xff] %v175_v43  ;;  %332 = vst [vmem:[%s585_s3 + $0x50] sm:$0xff] %v288_v44  ;;  %v177_v47 = vadd.f32 %v176_v45, %v450_v23  ;;  %v290_v48 = vadd.f32 %v289_v46, %v452_v24 }
  0xd6   :  { %v180_v49 = vpop.f32.mrf.mxu0  ;;  %v293_v50 = vpop.f32.mrf.mxu1 }
  0xd7   :  { %331 = vst [vmem:[%s585_s3 + $0x48] sm:$0xff] %v177_v47  ;;  %333 = vst [vmem:[%s585_s3 + $0x58] sm:$0xff] %v290_v48  ;;  %v181_v51 = vadd.f32 %v180_v49, %v446_v21  ;;  %v294_v52 = vadd.f32 %v293_v50, %v448_v22 }
  0xd8   :  { %v182_v53 = vpop.f32.mrf.mxu0  ;;  %v295_v54 = vpop.f32.mrf.mxu1 }
  0xd9   :  { %334 = vst [vmem:[%s585_s3 + $0x60] sm:$0xff] %v181_v51  ;;  %336 = vst [vmem:[%s585_s3 + $0x70] sm:$0xff] %v294_v52  ;;  %v183_v55 = vadd.f32 %v182_v53, %v450_v23  ;;  %v296_v56 = vadd.f32 %v295_v54, %v452_v24 }
  0xda   :  { %v186_v57 = vpop.f32.mrf.mxu0  ;;  %v299_v58 = vpop.f32.mrf.mxu1 }
  0xdb   :  { %335 = vst [vmem:[%s585_s3 + $0x68] sm:$0xff] %v183_v55  ;;  %337 = vst [vmem:[%s585_s3 + $0x78] sm:$0xff] %v296_v56  ;;  %v187_v59 = vadd.f32 %v186_v57, %v446_v21  ;;  %v300_v60 = vadd.f32 %v299_v58, %v448_v22 }
  0xdc   :  { %v188_v61 = vpop.f32.mrf.mxu0  ;;  %v301_v62 = vpop.f32.mrf.mxu1 }
  0xdd   :  { %338 = vst [vmem:[%s585_s3 + $0x80] sm:$0xff] %v187_v59  ;;  %340 = vst [vmem:[%s585_s3 + $0x90] sm:$0xff] %v300_v60  ;;  %v189_v63 = vadd.f32 %v188_v61, %v450_v23  ;;  %v302_v0 = vadd.f32 %v301_v62, %v452_v24 }
  0xde   :  { %v192_v1 = vpop.f32.mrf.mxu0  ;;  %v305_v2 = vpop.f32.mrf.mxu1 }
  0xdf   :  { %339 = vst [vmem:[%s585_s3 + $0x88] sm:$0xff] %v189_v63  ;;  %341 = vst [vmem:[%s585_s3 + $0x98] sm:$0xff] %v302_v0  ;;  %v193_v3 = vadd.f32 %v192_v1, %v446_v21  ;;  %v306_v4 = vadd.f32 %v305_v2, %v448_v22 }
  0xe0   :  { %v194_v5 = vpop.f32.mrf.mxu0  ;;  %v307_v6 = vpop.f32.mrf.mxu1 }
  0xe1   :  { %342 = vst [vmem:[%s585_s3 + $0xa0] sm:$0xff] %v193_v3  ;;  %344 = vst [vmem:[%s585_s3 + $0xb0] sm:$0xff] %v306_v4  ;;  %v195_v7 = vadd.f32 %v194_v5, %v450_v23  ;;  %v308_v8 = vadd.f32 %v307_v6, %v452_v24 }
  0xe2   :  { %v198_v9 = vpop.f32.mrf.mxu0  ;;  %v311_v10 = vpop.f32.mrf.mxu1 }
  0xe3   :  { %343 = vst [vmem:[%s585_s3 + $0xa8] sm:$0xff] %v195_v7  ;;  %345 = vst [vmem:[%s585_s3 + $0xb8] sm:$0xff] %v308_v8  ;;  %v199_v11 = vadd.f32 %v198_v9, %v446_v21  ;;  %v312_v12 = vadd.f32 %v311_v10, %v448_v22 }
  0xe4   :  { %v200_v13 = vpop.f32.mrf.mxu0  ;;  %v313_v14 = vpop.f32.mrf.mxu1 }
  0xe5   :  { %346 = vst [vmem:[%s585_s3 + $0xc0] sm:$0xff] %v199_v11  ;;  %348 = vst [vmem:[%s585_s3 + $0xd0] sm:$0xff] %v312_v12  ;;  %v201_v15 = vadd.f32 %v200_v13, %v450_v23  ;;  %v314_v16 = vadd.f32 %v313_v14, %v452_v24 }
  0xe6   :  { %v204_v17 = vpop.f32.mrf.mxu0  ;;  %v317_v18 = vpop.f32.mrf.mxu1 }
  0xe7   :  { %347 = vst [vmem:[%s585_s3 + $0xc8] sm:$0xff] %v201_v15  ;;  %349 = vst [vmem:[%s585_s3 + $0xd8] sm:$0xff] %v314_v16  ;;  %v205_v19 = vadd.f32 %v204_v17, %v446_v21  ;;  %v318_v20 = vadd.f32 %v317_v18, %v448_v22 }
  0xe8   :  { %v206_v25 = vpop.f32.mrf.mxu0  ;;  %v319_v26 = vpop.f32.mrf.mxu1 }
  0xe9   :  { %350 = vst [vmem:[%s585_s3 + $0xe0] sm:$0xff] %v205_v19  ;;  %352 = vst [vmem:[%s585_s3 + $0xf0] sm:$0xff] %v318_v20  ;;  %v207_v27 = vadd.f32 %v206_v25, %v450_v23  ;;  %v320_v28 = vadd.f32 %v319_v26, %v452_v24 }
  0xeb   :  { %351 = vst [vmem:[%s585_s3 + $0xe8] sm:$0xff] %v207_v27  ;;  %353 = vst [vmem:[%s585_s3 + $0xf8] sm:$0xff] %v320_v28 }

// kernel: lstm_forward.3
= control target key start
LH: loop header
LB: loop body
LE: loop exit
PB: predicated region body
PF: predicated region fallthrough
CT: control target
= control target key end

     0   :  { %s1616_s15 = smov 0   ;;  %s1618_s16 = smov 0   ;;  %s2127_s0 = inlined_call_operand.vmem [shape: f32[1,8,8,512], index: 0, kind: input, shape index: {}]   ;;  %s2128_s1 = inlined_call_operand.vmem [shape: f32[128,128], index: 1, kind: input, shape index: {}]   ;;  %s2129_s2 = inlined_call_operand.vmem [shape: f32[1,128], index: 2, kind: input, shape index: {}]   ;;  %s2130_s3 = inlined_call_operand.hbm [shape: f32[128,512], index: 3, kind: input, shape index: {}]   ;;  %s2131_s4 = inlined_call_operand.vmem [shape: f32[1,8,8,128], index: 4, kind: output, shape index: {}]  }
   0x1   :  { %s1620_s17 = smov 0  }
   0x2 LB: > { %s23_s18 = sadd.s32 1, %s1582_s16  ;;  %p1393_p0 = scmp.ge.s32.totalorder %s1586_s17, 1  ;;  %s1586_s17 = sphi %s1620_s17, %s14_s17   ;;  %s1582_s16 = sphi %s1618_s16, %s2211_s16   ;;  %s1578_s15 = sphi %s1616_s15, %s2210_s15  }
   0x3   : > { %p24_p1 = scmp.ge.s32.totalorder %s23_s18, 2  ;;  %p160_p2 = scmp.lt.s32.totalorder %s1586_s17, 3 }
   0x5   : > { %s2213_s18 = smov (%p24_p1, %s23_s18), 0  ;;  %p161_p3 = pnand %p1393_p0, %p160_p2 }
   0x7   : > { %164 = sbr.rel (%p161_p3) target bundleno = 1233 (0x4d1), region = 32 }
   0xc   : > { %s1394_s19 = sshll.u32 %s1578_s15, 2  ;;  %p1399_p5 = scmp.ne.s32.totalorder %s1578_s15, 0 }
   0xd   : > { %p196_p4 = scmp.lt.s32.totalorder %s1394_s19, 7  ;;  %s1588_s28 = smov (!%p1399_p5), [#allocation2]  }
   0xe   : > { %217 = sbr.rel (%p1399_p5) target bundleno = 30 (0x1e), region = 36  ;;  %s225_s29 = sshll.u32 (!%p1399_p5), %s1588_s28, 4  ;;  %s226_s29 = int_to_ptr.vmem [resolvable:$true] %s225_s29 }
   0xf   : > { %s2215_s19 = smov (!%p196_p4, %s1394_s19), 7  ;;  %s1550_s30 = scalar_lea.vmem (!%p1399_p5), %s226_s29, 8192 }
  0x10   : > { %s1416_s20 = sshll.u32 %s2215_s19, 5  ;;  %s1398_s21 = sshll.u32 %s2215_s19, 3 }
  0x11   : > { %s1637_s24 = scalar_lea.vmem %s2127_s0, %s1416_s20  ;;  %s1642_s27 = scalar_lea.vmem %s2131_s4, %s1398_s21 }
  0x12   : > { %p1551_p6 = scmp.ne.s32.totalorder (!%p1399_p5), %s226_s29, %s1550_s30  ;;  %p1555_p7 = scmp.lt.s32.totalorder (!%p1399_p5), %s226_s29, %s226_s29 }
  0x13   : > { %p1556_p8 = scmp.lt.s32.totalorder %s1550_s30, %s1550_s30 }
  0x15   : > { %p1557_p9 = por %p1556_p8, %p1555_p7 }
  0x17   : > { %p1558_p10 = pnand %p1557_p9, %p1551_p6 }
  0x19   : > { %1561 = shalt.err (!%p1558_p10)  }
  0x1a   : > { %228 = dma.hbm_to_vmem [thread:$0]  %s2130_s3, 8192, %s226_s29, [#allocation6] }
  0x1b   : > { %1574 = dma.done.wait [#allocation6], 8192 }
  0x1c   : > { %1575 = vsyncadd [#allocation6], 4294959104  ;;  %v1589_v0 = vmov 0.0  }
  0x1d   : > { %233 = vst [vmem:[#allocation4] sm:$0xff] %v1589_v0  ;;  %234 = vst [vmem:[#allocation5] sm:$0xff] %v1589_v0 }
  0x1e PF: > { %v1647_v1 = vld [vmem:[#allocation2 + $0x1e8] sm:$0xff]  ;;  %v1649_v2 = vld [vmem:[#allocation2 + $0x1e0] sm:$0xff]  ;;  %v2132_v5 = vmov 0.0   ;;  %v1772_v35 = vld [vmem:[#allocation2 + $0x1f8] sm:$0xff] }
  0x1f   : > { %2164 = vst [vmem:[#allocation12_spill] sm:$0xff] %v1647_v1  ;;  %v1651_v3 = vld [vmem:[#allocation2 + $0x1c8] sm:$0xff]  ;;  %305 = vmatprep.subr.mxu1 %v1647_v1  ;;  %v1654_v4 = vld [vmem:[#allocation2 + $0x1c0] sm:$0xff]  ;;  %369 = vmatprep.mubr.f32.mxu1 %v2132_v5  ;;  %2174 = vst [vmem:[#allocation22_spill] sm:$0xff] %v1772_v35 }
  0x20   : > { %306 = vmatpush1.msra.mxu1 %v1649_v2  ;;  %v1658_v6 = vld [vmem:[#allocation2 + $0x1a8] sm:$0xff]  ;;  %539 = vmatprep.subr.mxu0 %v1647_v1  ;;  %v1662_v7 = vld [vmem:[#allocation2 + $0x1a0] sm:$0xff]  ;;  %v1776_v36 = vld [vmem:[#allocation2 + $0x1f0] sm:$0xff] }
  0x21   : > { %307 = vmatprep.subr.mxu1 %v1651_v3  ;;  %540 = vmatpush1.msra.mxu0 %v1649_v2  ;;  %v1666_v8 = vld [vmem:[#allocation2 + $0x188] sm:$0xff]  ;;  %v1670_v9 = vld [vmem:[#allocation2 + $0x180] sm:$0xff]  ;;  %v1780_v37 = vld [vmem:[#allocation2 + $0x1d8] sm:$0xff] }
  0x22   : > { %308 = vmatpush1.msra.mxu1 %v1654_v4  ;;  %541 = vmatprep.subr.mxu0 %v1651_v3  ;;  %v1674_v10 = vld [vmem:[#allocation2 + $0x168] sm:$0xff]  ;;  %v1678_v11 = vld [vmem:[#allocation2 + $0x160] sm:$0xff]  ;;  %v1785_v38 = vld [vmem:[#allocation2 + $0x1d0] sm:$0xff] }
  0x23   : > { %309 = vmatprep.subr.mxu1 %v1658_v6  ;;  %542 = vmatpush1.msra.mxu0 %v1654_v4  ;;  %v1682_v12 = vld [vmem:[#allocation2 + $0x148] sm:$0xff]  ;;  %v1686_v13 = vld [vmem:[#allocation2 + $0x140] sm:$0xff]  ;;  %v1788_v39 = vld [vmem:[#allocation2 + $0x1b8] sm:$0xff] }
  0x24   : > { %310 = vmatpush1.msra.mxu1 %v1662_v7  ;;  %543 = vmatprep.subr.mxu0 %v1658_v6  ;;  %v1690_v14 = vld [vmem:[#allocation2 + $0x128] sm:$0xff]  ;;  %v1694_v15 = vld [vmem:[#allocation2 + $0x120] sm:$0xff]  ;;  %v1792_v40 = vld [vmem:[#allocation2 + $0x1b0] sm:$0xff] }
  0x25   : > { %311 = vmatprep.subr.mxu1 %v1666_v8  ;;  %544 = vmatpush1.msra.mxu0 %v1662_v7  ;;  %v1698_v16 = vld [vmem:[#allocation2 + $0x108] sm:$0xff]  ;;  %v1702_v17 = vld [vmem:[#allocation2 + $0x100] sm:$0xff]  ;;  %v1796_v41 = vld [vmem:[#allocation2 + $0x198] sm:$0xff] }
  0x26   : > { %312 = vmatpush1.msra.mxu1 %v1670_v9  ;;  %545 = vmatprep.subr.mxu0 %v1666_v8  ;;  %v1706_v18 = vld [vmem:[#allocation2 + $0xe8] sm:$0xff]  ;;  %v1710_v19 = vld [vmem:[#allocation2 + $0xe0] sm:$0xff]  ;;  %v1800_v42 = vld [vmem:[#allocation2 + $0x190] sm:$0xff] }
  0x27   : > { %313 = vmatprep.subr.mxu1 %v1674_v10  ;;  %546 = vmatpush1.msra.mxu0 %v1670_v9  ;;  %v1714_v20 = vld [vmem:[#allocation2 + $0xc8] sm:$0xff]  ;;  %v1718_v21 = vld [vmem:[#allocation2 + $0xc0] sm:$0xff]  ;;  %v1804_v43 = vld [vmem:[#allocation2 + $0x178] sm:$0xff] }
  0x28   : > { %314 = vmatpush1.msra.mxu1 %v1678_v11  ;;  %547 = vmatprep.subr.mxu0 %v1674_v10  ;;  %v1722_v22 = vld [vmem:[#allocation2 + $0xa8] sm:$0xff]  ;;  %v1726_v23 = vld [vmem:[#allocation2 + $0xa0] sm:$0xff]  ;;  %v1807_v44 = vld [vmem:[#allocation2 + $0x170] sm:$0xff] }
  0x29   : > { %315 = vmatprep.subr.mxu1 %v1682_v12  ;;  %548 = vmatpush1.msra.mxu0 %v1678_v11  ;;  %v1730_v24 = vld [vmem:[#allocation2 + $0x88] sm:$0xff]  ;;  %v1734_v25 = vld [vmem:[#allocation2 + $0x80] sm:$0xff]  ;;  %v1810_v45 = vld [vmem:[#allocation2 + $0x158] sm:$0xff] }
  0x2a   : > { %316 = vmatpush1.msra.mxu1 %v1686_v13  ;;  %549 = vmatprep.subr.mxu0 %v1682_v12  ;;  %2165 = vst [vmem:[#allocation13_spill] sm:$0xff] %v1734_v25  ;;  %v1738_v26 = vld [vmem:[#allocation2 + $0x68] sm:$0xff]  ;;  %v1742_v27 = vld [vmem:[#allocation2 + $0x60] sm:$0xff]  ;;  %v1813_v46 = vld [vmem:[#allocation2 + $0x150] sm:$0xff] }
  0x2b   : > { %317 = vmatprep.subr.mxu1 %v1690_v14  ;;  %550 = vmatpush1.msra.mxu0 %v1686_v13  ;;  %2166 = vst [vmem:[#allocation14_spill] sm:$0xff] %v1738_v26  ;;  %2167 = vst [vmem:[#allocation15_spill] sm:$0xff] %v1742_v27  ;;  %v1746_v28 = vld [vmem:[#allocation2 + $0x48] sm:$0xff]  ;;  %v1750_v29 = vld [vmem:[#allocation2 + $0x40] sm:$0xff] }
  0x2c   : > { %318 = vmatpush1.msra.mxu1 %v1694_v15  ;;  %551 = vmatprep.subr.mxu0 %v1690_v14  ;;  %2168 = vst [vmem:[#allocation16_spill] sm:$0xff] %v1746_v28  ;;  %2169 = vst [vmem:[#allocation17_spill] sm:$0xff] %v1750_v29  ;;  %v1754_v30 = vld [vmem:[#allocation2 + $0x28] sm:$0xff]  ;;  %v1758_v31 = vld [vmem:[#allocation2 + $0x20] sm:$0xff] }
  0x2d   : > { %319 = vmatprep.subr.mxu1 %v1698_v16  ;;  %552 = vmatpush1.msra.mxu0 %v1694_v15  ;;  %2170 = vst [vmem:[#allocation18_spill] sm:$0xff] %v1754_v30  ;;  %2171 = vst [vmem:[#allocation19_spill] sm:$0xff] %v1758_v31  ;;  %v1762_v32 = vld [vmem:[#allocation2 + $0x8] sm:$0xff]  ;;  %v1766_v33 = vld [vmem:[#allocation2] sm:$0xff] }
  0x2e   : > { %320 = vmatpush1.msra.mxu1 %v1702_v17  ;;  %553 = vmatprep.subr.mxu0 %v1698_v16  ;;  %2172 = vst [vmem:[#allocation20_spill] sm:$0xff] %v1762_v32  ;;  %2173 = vst [vmem:[#allocation21_spill] sm:$0xff] %v1766_v33  ;;  %v1770_v34 = vld [vmem:[#allocation4] sm:$0xff]  ;;  %v1816_v47 = vld [vmem:[#allocation2 + $0x138] sm:$0xff] }
  0x2f   : > { %321 = vmatprep.subr.mxu1 %v1706_v18  ;;  %554 = vmatpush1.msra.mxu0 %v1702_v17  ;;  %v1819_v48 = vld [vmem:[#allocation2 + $0x130] sm:$0xff]  ;;  %v1822_v49 = vld [vmem:[#allocation2 + $0x118] sm:$0xff] }
  0x30   : > { %322 = vmatpush1.msra.mxu1 %v1710_v19  ;;  %555 = vmatprep.subr.mxu0 %v1706_v18  ;;  %v1825_v50 = vld [vmem:[#allocation2 + $0x110] sm:$0xff]  ;;  %v1828_v51 = vld [vmem:[#allocation2 + $0xf8] sm:$0xff] }
  0x31   : > { %323 = vmatprep.subr.mxu1 %v1714_v20  ;;  %556 = vmatpush1.msra.mxu0 %v1710_v19  ;;  %v1831_v52 = vld [vmem:[#allocation2 + $0xf0] sm:$0xff]  ;;  %v1834_v53 = vld [vmem:[#allocation2 + $0xd8] sm:$0xff] }
  0x32   : > { %324 = vmatpush1.msra.mxu1 %v1718_v21  ;;  %557 = vmatprep.subr.mxu0 %v1714_v20  ;;  %v1837_v54 = vld [vmem:[#allocation2 + $0xd0] sm:$0xff]  ;;  %v1840_v55 = vld [vmem:[#allocation2 + $0xb8] sm:$0xff] }
  0x33   : > { %325 = vmatprep.subr.mxu1 %v1722_v22  ;;  %558 = vmatpush1.msra.mxu0 %v1718_v21  ;;  %v1843_v56 = vld [vmem:[#allocation2 + $0xb0] sm:$0xff]  ;;  %v1846_v57 = vld [vmem:[#allocation2 + $0x98] sm:$0xff] }
  0x34   : > { %326 = vmatpush1.msra.mxu1 %v1726_v23  ;;  %559 = vmatprep.subr.mxu0 %v1722_v22  ;;  %v1849_v58 = vld [vmem:[#allocation2 + $0x90] sm:$0xff]  ;;  %v1852_v59 = vld [vmem:[#allocation2 + $0x78] sm:$0xff] }
  0x35   : > { %327 = vmatprep.subr.mxu1 %v1730_v24  ;;  %560 = vmatpush1.msra.mxu0 %v1726_v23  ;;  %2175 = vst [vmem:[#allocation23_spill] sm:$0xff] %v1849_v58  ;;  %2176 = vst [vmem:[#allocation24_spill] sm:$0xff] %v1852_v59  ;;  %v1855_v60 = vld [vmem:[#allocation2 + $0x70] sm:$0xff]  ;;  %v1858_v61 = vld [vmem:[#allocation2 + $0x58] sm:$0xff] }
  0x36   : > { %328 = vmatpush1.msra.mxu1 %v1734_v25  ;;  %561 = vmatprep.subr.mxu0 %v1730_v24  ;;  %2177 = vst [vmem:[#allocation25_spill] sm:$0xff] %v1855_v60  ;;  %2178 = vst [vmem:[#allocation26_spill] sm:$0xff] %v1858_v61  ;;  %v1861_v62 = vld [vmem:[#allocation2 + $0x50] sm:$0xff]  ;;  %v1864_v63 = vld [vmem:[#allocation2 + $0x38] sm:$0xff] }
  0x37   : > { %329 = vmatprep.subr.mxu1 %v1738_v26  ;;  %562 = vmatpush1.msra.mxu0 %v1734_v25  ;;  %2179 = vst [vmem:[#allocation27_spill] sm:$0xff] %v1861_v62  ;;  %2180 = vst [vmem:[#allocation28_spill] sm:$0xff] %v1864_v63  ;;  %v1867_v0 = vld [vmem:[#allocation2 + $0x30] sm:$0xff] }
  0x38   : > { %330 = vmatpush1.msra.mxu1 %v1742_v27  ;;  %563 = vmatprep.subr.mxu0 %v1738_v26  ;;  %2181 = vst [vmem:[#allocation29_spill] sm:$0xff] %v1867_v0 }
  0x39   : > { %331 = vmatprep.subr.mxu1 %v1746_v28  ;;  %564 = vmatpush1.msra.mxu0 %v1742_v27 }
  0x3a   : > { %332 = vmatpush1.msra.mxu1 %v1750_v29  ;;  %565 = vmatprep.subr.mxu0 %v1746_v28 }
  0x3b   : > { %333 = vmatprep.subr.mxu1 %v1754_v30  ;;  %566 = vmatpush1.msra.mxu0 %v1750_v29 }
  0x3c   : > { %334 = vmatpush1.msra.mxu1 %v1758_v31  ;;  %567 = vmatprep.subr.mxu0 %v1754_v30 }
  0x3d   : > { %335 = vmatprep.subr.mxu1 %v1762_v32  ;;  %568 = vmatpush1.msra.mxu0 %v1758_v31  ;;  %v237_v31 = vld [vmem:[%s1637_s24] sm:$0xff] }
  0x3e   : > { %336 = vmatpush1.msra.mxu1 %v1766_v33  ;;  %569 = vmatprep.subr.mxu0 %v1762_v32 }
  0x3f   : > { %370 = vmatmul.mubr.f32.vlgmr.msra.gmra.mxu1 %v1770_v34  ;;  %376 = vmatprep.subr.mxu1 %v1772_v35 }
  0x40   : > { %377 = vmatpush1.msra.mxu1 %v1776_v36  ;;  %440 = vmatprep.mubr.f32.mxu1 %v2132_v5 }
  0x41   : > { %378 = vmatprep.subr.mxu1 %v1780_v37  ;;  %570 = vmatpush1.msra.mxu0 %v1766_v33  ;;  %v2184_v33 = vmov 0.0  }
  0x42   : > { %379 = vmatpush1.msra.mxu1 %v1785_v38  ;;  %603 = vmatprep.mubr.f32.mxu0 %v2132_v5  ;;  %v1870_v5 = vld [vmem:[#allocation2 + $0x18] sm:$0xff] }
  0x43   : > { %380 = vmatprep.subr.mxu1 %v1788_v39  ;;  %774 = vmatprep.subr.mxu0 %v1647_v1  ;;  %2182 = vst [vmem:[#allocation30_spill] sm:$0xff] %v1870_v5  ;;  %v1873_v1 = vld [vmem:[#allocation2 + $0x10] sm:$0xff] }
  0x44   : > { %381 = vmatpush1.msra.mxu1 %v1792_v40  ;;  %2183 = vst [vmem:[#allocation31_spill] sm:$0xff] %v1873_v1 }
  0x45   : > { %382 = vmatprep.subr.mxu1 %v1796_v41 }
  0x46   : > { %383 = vmatpush1.msra.mxu1 %v1800_v42 }
  0x47   : > { %384 = vmatprep.subr.mxu1 %v1804_v43 }
  0x48   : > { %385 = vmatpush1.msra.mxu1 %v1807_v44 }
  0x49   : > { %386 = vmatprep.subr.mxu1 %v1810_v45 }
  0x4a   : > { %387 = vmatpush1.msra.mxu1 %v1813_v46 }
  0x4b   : > { %388 = vmatprep.subr.mxu1 %v1816_v47 }
  0x4c   : > { %389 = vmatpush1.msra.mxu1 %v1819_v48 }
  0x4d   : > { %390 = vmatprep.subr.mxu1 %v1822_v49 }
  0x4e   : > { %391 = vmatpush1.msra.mxu1 %v1825_v50 }
  0x4f   : > { %392 = vmatprep.subr.mxu1 %v1828_v51 }
  0x50   : > { %393 = vmatpush1.msra.mxu1 %v1831_v52 }
  0x51   : > { %394 = vmatprep.subr.mxu1 %v1834_v53 }
  0x52   : > { %395 = vmatpush1.msra.mxu1 %v1837_v54 }
  0x53   : > { %396 = vmatprep.subr.mxu1 %v1840_v55 }
  0x54   : > { %397 = vmatpush1.msra.mxu1 %v1843_v56 }
  0x55   : > { %398 = vmatprep.subr.mxu1 %v1846_v57 }
  0x56   : > { %399 = vmatpush1.msra.mxu1 %v1849_v58 }
  0x57   : > { %400 = vmatprep.subr.mxu1 %v1852_v59 }
  0x58   : > { %401 = vmatpush1.msra.mxu1 %v1855_v60 }
  0x59   : > { %402 = vmatprep.subr.mxu1 %v1858_v61 }
  0x5a   : > { %403 = vmatpush1.msra.mxu1 %v1861_v62 }
  0x5b   : > { %404 = vmatprep.subr.mxu1 %v1864_v63 }
  0x5c   : > { %405 = vmatpush1.msra.mxu1 %v1867_v0 }
  0x5d   : > { %406 = vmatprep.subr.mxu1 %v1870_v5 }
  0x5e   : > { %407 = vmatpush1.msra.mxu1 %v1873_v1 }
  0x5f   : > { %441 = vmatmul.mubr.f32.vlgmr.msra.gmra.mxu1 %v1770_v34  ;;  %610 = vmatprep.subr.mxu1 %v1772_v35 }
  0x60   : > { %611 = vmatpush1.msra.mxu1 %v1776_v36  ;;  %674 = vmatprep.mubr.f32.mxu1 %v2184_v33  ;;  %v238_v33 = vld [vmem:[%s1637_s24 + $0x8] sm:$0xff] }
  0x61   : > { %612 = vmatprep.subr.mxu1 %v1780_v37 }
  0x62   : > { %613 = vmatpush1.msra.mxu1 %v1785_v38 }
  0x63   : > { %614 = vmatprep.subr.mxu1 %v1788_v39 }
  0x64   : > { %615 = vmatpush1.msra.mxu1 %v1792_v40 }
  0x65   : > { %616 = vmatprep.subr.mxu1 %v1796_v41 }
  0x66   : > { %617 = vmatpush1.msra.mxu1 %v1800_v42 }
  0x67   : > { %618 = vmatprep.subr.mxu1 %v1804_v43 }
  0x68   : > { %619 = vmatpush1.msra.mxu1 %v1807_v44 }
  0x69   : > { %620 = vmatprep.subr.mxu1 %v1810_v45 }
  0x6a   : > { %621 = vmatpush1.msra.mxu1 %v1813_v46 }
  0x6b   : > { %622 = vmatprep.subr.mxu1 %v1816_v47 }
  0x6c   : > { %623 = vmatpush1.msra.mxu1 %v1819_v48 }
  0x6d   : > { %624 = vmatprep.subr.mxu1 %v1822_v49 }
  0x6e   : > { %625 = vmatpush1.msra.mxu1 %v1825_v50 }
  0x6f   : > { %626 = vmatprep.subr.mxu1 %v1828_v51 }
  0x70   : > { %627 = vmatpush1.msra.mxu1 %v1831_v52 }
  0x71   : > { %628 = vmatprep.subr.mxu1 %v1834_v53 }
  0x72   : > { %629 = vmatpush1.msra.mxu1 %v1837_v54 }
  0x73   : > { %630 = vmatprep.subr.mxu1 %v1840_v55 }
  0x74   : > { %631 = vmatpush1.msra.mxu1 %v1843_v56 }
  0x75   : > { %632 = vmatprep.subr.mxu1 %v1846_v57 }
  0x76   : > { %633 = vmatpush1.msra.mxu1 %v1849_v58 }
  0x77   : > { %634 = vmatprep.subr.mxu1 %v1852_v59 }
  0x78   : > { %635 = vmatpush1.msra.mxu1 %v1855_v60  ;;  %v240_v60 = vld [vmem:[%s1637_s24 + $0x18] sm:$0xff] }
  0x79   : > { %636 = vmatprep.subr.mxu1 %v1858_v61 }
  0x7a   : > { %637 = vmatpush1.msra.mxu1 %v1861_v62 }
  0x7b   : > { %638 = vmatprep.subr.mxu1 %v1864_v63  ;;  %v239_v63 = vld [vmem:[%s1637_s24 + $0x10] sm:$0xff] }
  0x7c   : > { %639 = vmatpush1.msra.mxu1 %v1867_v0 }
  0x7d   : > { %640 = vmatprep.subr.mxu1 %v1870_v5 }
  0x7e   : > { %641 = vmatpush1.msra.mxu1 %v1873_v1 }
  0x7f   : > { %845 = vmatprep.subr.mxu1 %v1772_v35 }
  0xff   : > { %v371_v34 = vpop.f32.mrf.mxu1 }
 0x100   : > { %v447_v29 = vadd.f32 %v371_v34, %v237_v31  ;;  %v2203_v34 = vmov 0.0  }
 0x101   : > { %v373_v32 = vpop.f32.mrf.mxu1 }
 0x102   : > { %v448_v30 = vadd.f32 %v373_v32, %v238_v33  ;;  %v451_v62 = vmul.f32 0.5, %v447_v29  ;;  %v236_v32 = vld [vmem:[#allocation5] sm:$0xff] }
 0x104   : > { %v455_v61 = vmul.f32 0.5, %v448_v30 }
 0x106   : > { %1502 = vtanh.f32 %v455_v61 }
 0x107   : > { %1504 = vtanh.f32 %v451_v62 }
 0x113   : > { %v1503_v1 = vpop.eup %1502 }
 0x114   : > { %v1505_v59 = vpop.eup %1504  ;;  %v457_v35 = vadd.f32 1.0, %v1503_v1  ;;  %v2186_v1 = vld [vmem:[#allocation13_spill] sm:$0xff] }
 0x115   : > { %v453_v58 = vadd.f32 1.0, %v1505_v59  ;;  %v2201_v59 = vld [vmem:[#allocation30_spill] sm:$0xff] }
 0x116   : > { %v458_v25 = vmul.f32 0.5, %v457_v35  ;;  %v2199_v35 = vld [vmem:[#allocation29_spill] sm:$0xff] }
 0x117   : > { %v454_v31 = vmul.f32 0.5, %v453_v58  ;;  %v2200_v58 = vld [vmem:[#allocation20_spill] sm:$0xff] }
 0x118   : > { %v464_v29 = vmul.f32 %v458_v25, %v236_v32  ;;  %v2196_v25 = vld [vmem:[#allocation18_spill] sm:$0xff]  ;;  %v2204_v32 = vld [vmem:[#allocation31_spill] sm:$0xff] }
 0x11f   : > { %v442_v28 = vpop.f32.mrf.mxu1 }
 0x120   : > { %v449_v0 = vadd.f32 %v442_v28, %v239_v63 }
 0x121   : > { %v444_v5 = vpop.f32.mrf.mxu1 }
 0x122   : > { %1506 = vtanh.f32 %v449_v0  ;;  %v450_v27 = vadd.f32 %v444_v5, %v240_v60  ;;  %v2202_v0 = vld [vmem:[#allocation21_spill] sm:$0xff] }
 0x124   : > { %v460_v26 = vmul.f32 0.5, %v450_v27  ;;  %v2198_v27 = vld [vmem:[#allocation19_spill] sm:$0xff] }
 0x126   : > { %1508 = vtanh.f32 %v460_v26  ;;  %v2197_v26 = vld [vmem:[#allocation28_spill] sm:$0xff] }
 0x12f   : > { %v1507_v30 = vpop.eup %1506 }
 0x130   : > { %v465_v33 = vmul.f32 %v1507_v30, %v454_v31  ;;  %v2205_v31 = vld [vmem:[#allocation12_spill] sm:$0xff]  ;;  %v2206_v30 = vld [vmem:[#allocation22_spill] sm:$0xff] }
 0x132   : > { %v1917_v61 = vadd.f32 %v465_v33, %v464_v29  ;;  %v1400_v29 = vld [vmem:[%s1637_s24 + $0x20] sm:$0xff] }
 0x133   : > { %v1509_v28 = vpop.eup %1508 }
 0x134   : > { %1510 = vtanh.f32 %v1917_v61  ;;  %v462_v62 = vadd.f32 1.0, %v1509_v28  ;;  %v1401_v28 = vld [vmem:[%s1637_s24 + $0x28] sm:$0xff] }
 0x136   : > { %v463_v63 = vmul.f32 0.5, %v462_v62 }
 0x141   : > { %v1511_v5 = vpop.eup %1510 }
 0x142   : > { %v1920_v60 = vmul.f32 %v1511_v5, %v463_v63 }
 0x144   : > { %2185 = vst [vmem:[#allocation32_spill] sm:$0xff] %v1920_v60  ;;  %604 = vmatmul.mubr.f32.vlgmr.msra.gmra.mxu0 %v1920_v60  ;;  %675 = vmatmul.mubr.f32.vlgmr.msra.gmra.mxu1 %v1920_v60 }
 0x145   : > { %775 = vmatpush1.msra.mxu0 %v1649_v2  ;;  %846 = vmatpush1.msra.mxu1 %v1776_v36 }
 0x146   : > { %776 = vmatprep.subr.mxu0 %v1651_v3  ;;  %847 = vmatprep.subr.mxu1 %v1780_v37 }
 0x147   : > { %777 = vmatpush1.msra.mxu0 %v1654_v4  ;;  %848 = vmatpush1.msra.mxu1 %v1785_v38 }
 0x148   : > { %778 = vmatprep.subr.mxu0 %v1658_v6  ;;  %849 = vmatprep.subr.mxu1 %v1788_v39 }
 0x149   : > { %779 = vmatpush1.msra.mxu0 %v1662_v7  ;;  %850 = vmatpush1.msra.mxu1 %v1792_v40 }
 0x14a   : > { %780 = vmatprep.subr.mxu0 %v1666_v8  ;;  %851 = vmatprep.subr.mxu1 %v1796_v41 }
 0x14b   : > { %781 = vmatpush1.msra.mxu0 %v1670_v9  ;;  %852 = vmatpush1.msra.mxu1 %v1800_v42 }
 0x14c   : > { %782 = vmatprep.subr.mxu0 %v1674_v10  ;;  %853 = vmatprep.subr.mxu1 %v1804_v43 }
 0x14d   : > { %783 = vmatpush1.msra.mxu0 %v1678_v11  ;;  %854 = vmatpush1.msra.mxu1 %v1807_v44 }
 0x14e   : > { %784 = vmatprep.subr.mxu0 %v1682_v12  ;;  %855 = vmatprep.subr.mxu1 %v1810_v45 }
 0x14f   : > { %785 = vmatpush1.msra.mxu0 %v1686_v13  ;;  %856 = vmatpush1.msra.mxu1 %v1813_v46 }
 0x150   : > { %786 = vmatprep.subr.mxu0 %v1690_v14  ;;  %857 = vmatprep.subr.mxu1 %v1816_v47 }
 0x151   : > { %787 = vmatpush1.msra.mxu0 %v1694_v15  ;;  %858 = vmatpush1.msra.mxu1 %v1819_v48 }
 0x152   : > { %788 = vmatprep.subr.mxu0 %v1698_v16  ;;  %859 = vmatprep.subr.mxu1 %v1822_v49  ;;  %v2187_v16 = vld [vmem:[#allocation23_spill] sm:$0xff] }
 0x153   : > { %789 = vmatpush1.msra.mxu0 %v1702_v17  ;;  %860 = vmatpush1.msra.mxu1 %v1825_v50  ;;  %v2188_v17 = vld [vmem:[#allocation14_spill] sm:$0xff] }
 0x154   : > { %790 = vmatprep.subr.mxu0 %v1706_v18  ;;  %861 = vmatprep.subr.mxu1 %v1828_v51  ;;  %v2189_v18 = vld [vmem:[#allocation24_spill] sm:$0xff] }
 0x155   : > { %791 = vmatpush1.msra.mxu0 %v1710_v19  ;;  %862 = vmatpush1.msra.mxu1 %v1831_v52  ;;  %v2190_v19 = vld [vmem:[#allocation15_spill] sm:$0xff] }
 0x156   : > { %792 = vmatprep.subr.mxu0 %v1714_v20  ;;  %863 = vmatprep.subr.mxu1 %v1834_v53  ;;  %v2191_v20 = vld [vmem:[#allocation25_spill] sm:$0xff] }
 0x157   : > { %793 = vmatpush1.msra.mxu0 %v1718_v21  ;;  %864 = vmatpush1.msra.mxu1 %v1837_v54  ;;  %v2192_v21 = vld [vmem:[#allocation16_spill] sm:$0xff] }
 0x158   : > { %794 = vmatprep.subr.mxu0 %v1722_v22  ;;  %865 = vmatprep.subr.mxu1 %v1840_v55  ;;  %v2193_v22 = vld [vmem:[#allocation26_spill] sm:$0xff] }
 0x159   : > { %795 = vmatpush1.msra.mxu0 %v1726_v23  ;;  %866 = vmatpush1.msra.mxu1 %v1843_v56  ;;  %v2194_v23 = vld [vmem:[#allocation17_spill] sm:$0xff] }
 0x15a   : > { %796 = vmatprep.subr.mxu0 %v1730_v24  ;;  %867 = vmatprep.subr.mxu1 %v1846_v57  ;;  %v2195_v24 = vld [vmem:[#allocation27_spill] sm:$0xff] }
 0x15b   : > { %797 = vmatpush1.msra.mxu0 %v2186_v1  ;;  %868 = vmatpush1.msra.mxu1 %v2187_v16 }
 0x15c   : > { %798 = vmatprep.subr.mxu0 %v2188_v17  ;;  %869 = vmatprep.subr.mxu1 %v2189_v18  ;;  %v1402_v17 = vld [vmem:[%s1637_s24 + $0x30] sm:$0xff] }
 0x15d   : > { %799 = vmatpush1.msra.mxu0 %v2190_v19  ;;  %870 = vmatpush1.msra.mxu1 %v2191_v20 }
 0x15e   : > { %800 = vmatprep.subr.mxu0 %v2192_v21  ;;  %871 = vmatprep.subr.mxu1 %v2193_v22 }
 0x15f   : > { %801 = vmatpush1.msra.mxu0 %v2194_v23  ;;  %872 = vmatpush1.msra.mxu1 %v2195_v24 }
 0x160   : > { %802 = vmatprep.subr.mxu0 %v2196_v25  ;;  %873 = vmatprep.subr.mxu1 %v2197_v26  ;;  %v1403_v25 = vld [vmem:[%s1637_s24 + $0x38] sm:$0xff] }
 0x161   : > { %803 = vmatpush1.msra.mxu0 %v2198_v27  ;;  %874 = vmatpush1.msra.mxu1 %v2199_v35 }
 0x162   : > { %804 = vmatprep.subr.mxu0 %v2200_v58  ;;  %875 = vmatprep.subr.mxu1 %v2201_v59 }
 0x163   : > { %805 = vmatpush1.msra.mxu0 %v2202_v0  ;;  %838 = vmatprep.mubr.f32.mxu0 %v2203_v34 }
 0x164   : > { %876 = vmatpush1.msra.mxu1 %v2204_v32  ;;  %909 = vmatprep.mubr.f32.mxu1 %v2203_v34 }
 0x165   : > { %1009 = vmatprep.subr.mxu0 %v2205_v31  ;;  %1080 = vmatprep.subr.mxu1 %v2206_v30 }
 0x204   : > { %v605_v33 = vpop.f32.mrf.mxu0  ;;  %v676_v19 = vpop.f32.mrf.mxu1 }
 0x205   : > { %v681_v62 = vadd.f32 %v1400_v29, %v605_v33  ;;  %v683_v23 = vadd.f32 %v1402_v17, %v676_v19 }
 0x206   : > { %v607_v63 = vpop.f32.mrf.mxu0  ;;  %v678_v27 = vpop.f32.mrf.mxu1 }
 0x207   : > { %v685_v5 = vmul.f32 0.5, %v681_v62  ;;  %v682_v1 = vadd.f32 %v1401_v28, %v607_v63  ;;  %v684_v58 = vadd.f32 %v1403_v25, %v678_v27 }
 0x209   : > { %1512 = vtanh.f32 %v685_v5  ;;  %v689_v21 = vmul.f32 0.5, %v682_v1  ;;  %v694_v0 = vmul.f32 0.5, %v684_v58 }
 0x20b   : > { %1514 = vtanh.f32 %v689_v21 }
 0x20c   : > { %1516 = vtanh.f32 %v683_v23 }
 0x20d   : > { %1518 = vtanh.f32 %v694_v0  ;;  %v1195_v0 = vld [vmem:[%s2128_s1 + $0x70] sm:$0xff] }
 0x216   : > { %v1513_v31 = vpop.eup %1512 }
 0x217   : > { %v687_v30 = vadd.f32 1.0, %v1513_v31  ;;  %v2209_v31 = vld [vmem:[#allocation32_spill] sm:$0xff] }
 0x218   : > { %v1515_v60 = vpop.eup %1514 }
 0x219   : > { %v688_v32 = vmul.f32 0.5, %v687_v30  ;;  %v691_v59 = vadd.f32 1.0, %v1515_v60  ;;  %v1517_v33 = vpop.eup %1516  ;;  %v1194_v30 = vld [vmem:[%s2128_s1 + $0x68] sm:$0xff] }
 0x21a   : > { %v1519_v5 = vpop.eup %1518 }
 0x21b   : > { %v692_v29 = vmul.f32 0.5, %v691_v59  ;;  %v699_v62 = vmul.f32 %v1517_v33, %v688_v32  ;;  %v696_v1 = vadd.f32 1.0, %v1519_v5  ;;  %v1192_v33 = vld [vmem:[%s2128_s1 + $0x58] sm:$0xff] }
 0x21c   : > { %v1188_v5 = vld [vmem:[%s2128_s1 + $0x38] sm:$0xff] }
 0x21d   : > { %v698_v28 = vmul.f32 %v692_v29, %v1917_v61  ;;  %v697_v17 = vmul.f32 0.5, %v696_v1  ;;  %v1193_v29 = vld [vmem:[%s2128_s1 + $0x60] sm:$0xff]  ;;  %v1187_v1 = vld [vmem:[%s2128_s1 + $0x30] sm:$0xff] }
 0x21f   : > { %v1995_v63 = vadd.f32 %v699_v62, %v698_v28  ;;  %v1191_v28 = vld [vmem:[%s2128_s1 + $0x50] sm:$0xff]  ;;  %v1190_v62 = vld [vmem:[%s2128_s1 + $0x48] sm:$0xff] }
 0x221   : > { %1520 = vtanh.f32 %v1995_v63 }
 0x22e   : > { %v1521_v19 = vpop.eup %1520 }
 0x22f   : > { %v1998_v21 = vmul.f32 %v1521_v19, %v697_v17  ;;  %v1186_v17 = vld [vmem:[%s2128_s1 + $0x28] sm:$0xff]  ;;  %v1185_v19 = vld [vmem:[%s2128_s1 + $0x20] sm:$0xff] }
 0x231   : > { %839 = vmatmul.mubr.f32.vlgmr.msra.gmra.mxu0 %v1998_v21  ;;  %910 = vmatmul.mubr.f32.vlgmr.msra.gmra.mxu1 %v1998_v21 }
 0x232   : > { %1010 = vmatpush1.msra.mxu0 %v1649_v2  ;;  %1081 = vmatpush1.msra.mxu1 %v1776_v36  ;;  %v2207_v2 = vld [vmem:[#allocation30_spill] sm:$0xff] }
 0x233   : > { %1011 = vmatprep.subr.mxu0 %v1651_v3  ;;  %1082 = vmatprep.subr.mxu1 %v1780_v37  ;;  %v2208_v3 = vld [vmem:[#allocation31_spill] sm:$0xff]  ;;  %v957_v36 = vld [vmem:[#allocation2 + $0x60] sm:$0xff] }
 0x234   : > { %1012 = vmatpush1.msra.mxu0 %v1654_v4  ;;  %1083 = vmatpush1.msra.mxu1 %v1785_v38  ;;  %v978_v4 = vld [vmem:[#allocation2 + $0x108] sm:$0xff]  ;;  %v953_v38 = vld [vmem:[#allocation2 + $0x40] sm:$0xff] }
 0x235   : > { %1013 = vmatprep.subr.mxu0 %v1658_v6  ;;  %1084 = vmatprep.subr.mxu1 %v1788_v39  ;;  %v977_v6 = vld [vmem:[#allocation2 + $0x100] sm:$0xff]  ;;  %v954_v37 = vld [vmem:[#allocation2 + $0x48] sm:$0xff] }
 0x236   : > { %1014 = vmatpush1.msra.mxu0 %v1662_v7  ;;  %1085 = vmatpush1.msra.mxu1 %v1792_v40  ;;  %v974_v7 = vld [vmem:[#allocation2 + $0xe8] sm:$0xff]  ;;  %v949_v40 = vld [vmem:[#allocation2 + $0x20] sm:$0xff] }
 0x237   : > { %1015 = vmatprep.subr.mxu0 %v1666_v8  ;;  %1086 = vmatprep.subr.mxu1 %v1796_v41  ;;  %v973_v8 = vld [vmem:[#allocation2 + $0xe0] sm:$0xff]  ;;  %v950_v39 = vld [vmem:[#allocation2 + $0x28] sm:$0xff] }
 0x238   : > { %1016 = vmatpush1.msra.mxu0 %v1670_v9  ;;  %1087 = vmatpush1.msra.mxu1 %v1800_v42  ;;  %v970_v9 = vld [vmem:[#allocation2 + $0xc8] sm:$0xff]  ;;  %v945_v42 = vld [vmem:[#allocation2] sm:$0xff] }
 0x239   : > { %1017 = vmatprep.subr.mxu0 %v1674_v10  ;;  %1088 = vmatprep.subr.mxu1 %v1804_v43  ;;  %v969_v10 = vld [vmem:[#allocation2 + $0xc0] sm:$0xff]  ;;  %v946_v41 = vld [vmem:[#allocation2 + $0x8] sm:$0xff]  ;;  %v1196_v43 = vld [vmem:[%s2128_s1 + $0x78] sm:$0xff] }
 0x23a   : > { %1018 = vmatpush1.msra.mxu0 %v1678_v11  ;;  %1089 = vmatpush1.msra.mxu1 %v1807_v44  ;;  %v966_v11 = vld [vmem:[#allocation2 + $0xa8] sm:$0xff]  ;;  %v1404_v44 = vld [vmem:[%s1637_s24 + $0x40] sm:$0xff] }
 0x23b   : > { %1019 = vmatprep.subr.mxu0 %v1682_v12  ;;  %1090 = vmatprep.subr.mxu1 %v1810_v45  ;;  %v965_v12 = vld [vmem:[#allocation2 + $0xa0] sm:$0xff] }
 0x23c   : > { %1020 = vmatpush1.msra.mxu0 %v1686_v13  ;;  %1091 = vmatpush1.msra.mxu1 %v1813_v46  ;;  %v962_v13 = vld [vmem:[#allocation2 + $0x88] sm:$0xff] }
 0x23d   : > { %1021 = vmatprep.subr.mxu0 %v1690_v14  ;;  %1092 = vmatprep.subr.mxu1 %v1816_v47  ;;  %v961_v14 = vld [vmem:[#allocation2 + $0x80] sm:$0xff]  ;;  %v1405_v46 = vld [vmem:[%s1637_s24 + $0x48] sm:$0xff] }
 0x23e   : > { %1022 = vmatpush1.msra.mxu0 %v1694_v15  ;;  %1093 = vmatpush1.msra.mxu1 %v1819_v48  ;;  %v958_v15 = vld [vmem:[#allocation2 + $0x68] sm:$0xff] }
 0x23f   : > { %1094 = vmatprep.subr.mxu1 %v1822_v49  ;;  %1073 = vmatprep.mubr.f32.mxu0 %v2203_v34 }
 0x240   : > { %1095 = vmatpush1.msra.mxu1 %v1825_v50  ;;  %1144 = vmatprep.mubr.f32.mxu1 %v2203_v34 }
 0x241   : > { %1096 = vmatprep.subr.mxu1 %v1828_v51  ;;  %1023 = vmatprep.subr.mxu0 %v978_v4  ;;  %v1406_v51 = vld [vmem:[%s1637_s24 + $0x50] sm:$0xff]  ;;  %v1182_v4 = vld [vmem:[%s2128_s1 + $0x8] sm:$0xff] }
 0x242   : > { %1097 = vmatpush1.msra.mxu1 %v1831_v52  ;;  %1024 = vmatpush1.msra.mxu0 %v977_v6  ;;  %v1181_v6 = vld [vmem:[%s2128_s1] sm:$0xff] }
 0x243   : > { %1098 = vmatprep.subr.mxu1 %v1834_v53  ;;  %1025 = vmatprep.subr.mxu0 %v974_v7  ;;  %v1408_v7 = vld [vmem:[%s1637_s24 + $0x60] sm:$0xff] }
 0x244   : > { %1099 = vmatpush1.msra.mxu1 %v1837_v54  ;;  %1026 = vmatpush1.msra.mxu0 %v973_v8 }
 0x245   : > { %1100 = vmatprep.subr.mxu1 %v1840_v55  ;;  %1027 = vmatprep.subr.mxu0 %v970_v9  ;;  %v1407_v55 = vld [vmem:[%s1637_s24 + $0x58] sm:$0xff]  ;;  %v1409_v9 = vld [vmem:[%s1637_s24 + $0x68] sm:$0xff] }
 0x246   : > { %1101 = vmatpush1.msra.mxu1 %v1843_v56  ;;  %1028 = vmatpush1.msra.mxu0 %v969_v10 }
 0x247   : > { %1102 = vmatprep.subr.mxu1 %v1846_v57  ;;  %1029 = vmatprep.subr.mxu0 %v966_v11 }
 0x248   : > { %1103 = vmatpush1.msra.mxu1 %v2187_v16  ;;  %1030 = vmatpush1.msra.mxu0 %v965_v12 }
 0x249   : > { %1104 = vmatprep.subr.mxu1 %v2189_v18  ;;  %1031 = vmatprep.subr.mxu0 %v962_v13 }
 0x24a   : > { %1105 = vmatpush1.msra.mxu1 %v2191_v20  ;;  %1032 = vmatpush1.msra.mxu0 %v961_v14  ;;  %v1410_v14 = vld [vmem:[%s1637_s24 + $0x70] sm:$0xff] }
 0x24b   : > { %1106 = vmatprep.subr.mxu1 %v2193_v22  ;;  %1033 = vmatprep.subr.mxu0 %v958_v15 }
 0x24c   : > { %1107 = vmatpush1.msra.mxu1 %v2195_v24  ;;  %1034 = vmatpush1.msra.mxu0 %v957_v36 }
 0x24d   : > { %1108 = vmatprep.subr.mxu1 %v2197_v26  ;;  %1035 = vmatprep.subr.mxu0 %v954_v37 }
 0x24e   : > { %1109 = vmatpush1.msra.mxu1 %v2199_v35  ;;  %1036 = vmatpush1.msra.mxu0 %v953_v38  ;;  %v1411_v38 = vld [vmem:[%s1637_s24 + $0x78] sm:$0xff] }
 0x24f   : > { %1110 = vmatprep.subr.mxu1 %v2207_v2  ;;  %1037 = vmatprep.subr.mxu0 %v950_v39  ;;  %v1184_v2 = vld [vmem:[%s2128_s1 + $0x18] sm:$0xff] }
 0x250   : > { %1111 = vmatpush1.msra.mxu1 %v2208_v3  ;;  %1038 = vmatpush1.msra.mxu0 %v949_v40  ;;  %v1183_v3 = vld [vmem:[%s2128_s1 + $0x10] sm:$0xff] }
 0x251   : > { %1039 = vmatprep.subr.mxu0 %v946_v41 }
 0x252   : > { %1040 = vmatpush1.msra.mxu0 %v945_v42 }
 0x253   : > { %1437 = vmatprep.subr.mxu0 %v1196_v43 }
 0x2f1   : > { %v840_v45 = vpop.f32.mrf.mxu0  ;;  %v911_v52 = vpop.f32.mrf.mxu1 }
 0x2f2   : > { %v916_v47 = vadd.f32 %v1404_v44, %v840_v45  ;;  %v918_v54 = vadd.f32 %v1406_v51, %v911_v52  ;;  %v1412_v52 = vld [vmem:[%s2129_s2] ss:$0 sm:$0xff] }
 0x2f3   : > { %v842_v48 = vpop.f32.mrf.mxu0  ;;  %v913_v56 = vpop.f32.mrf.mxu1 }
 0x2f4   : > { %v920_v49 = vmul.f32 0.5, %v916_v47  ;;  %v917_v50 = vadd.f32 %v1405_v46, %v842_v48  ;;  %v919_v57 = vadd.f32 %v1407_v55, %v913_v56 }
 0x2f6   : > { %1522 = vtanh.f32 %v920_v49  ;;  %v924_v53 = vmul.f32 0.5, %v917_v50  ;;  %v929_v61 = vmul.f32 0.5, %v919_v57 }
 0x2f8   : > { %1524 = vtanh.f32 %v924_v53 }
 0x2f9   : > { %1526 = vtanh.f32 %v918_v54 }
 0x2fa   : > { %1528 = vtanh.f32 %v929_v61 }
 0x303   : > { %v1523_v60 = vpop.eup %1522 }
 0x304   : > { %v922_v16 = vadd.f32 1.0, %v1523_v60 }
 0x305   : > { %v1525_v18 = vpop.eup %1524 }
 0x306   : > { %v923_v20 = vmul.f32 0.5, %v922_v16  ;;  %v926_v22 = vadd.f32 1.0, %v1525_v18  ;;  %v1527_v26 = vpop.eup %1526 }
 0x307   : > { %v1529_v32 = vpop.eup %1528 }
 0x308   : > { %v927_v24 = vmul.f32 0.5, %v926_v22  ;;  %v934_v59 = vmul.f32 %v1527_v26, %v923_v20  ;;  %v931_v23 = vadd.f32 1.0, %v1529_v32 }
 0x30a   : > { %v933_v35 = vmul.f32 %v927_v24, %v1995_v63  ;;  %v932_v25 = vmul.f32 0.5, %v931_v23  ;;  %v1189_v63 = vld [vmem:[%s2128_s1 + $0x40] sm:$0xff] }
 0x30c   : > { %v2056_v34 = vadd.f32 %v934_v59, %v933_v35 }
 0x30e   : > { %1530 = vtanh.f32 %v2056_v34 }
 0x31b   : > { %v1531_v27 = vpop.eup %1530 }
 0x31c   : > { %v937_v58 = vmul.f32 %v1531_v27, %v932_v25 }
 0x31e   : > { %1074 = vmatmul.mubr.f32.vlgmr.msra.gmra.mxu0 %v937_v58  ;;  %1145 = vmatmul.mubr.f32.vlgmr.msra.gmra.mxu1 %v937_v58 }
 0x31f   : > { %1438 = vmatpush3.msra.mxu0 %v1196_v43  ;;  %1469 = vmatprep.mubr.f32.mxu0 %v2209_v31 }
 0x320   : > { %1439 = vmatprep.subr.mxu0 %v1195_v0 }
 0x321   : > { %1440 = vmatpush3.msra.mxu0 %v1195_v0 }
 0x322   : > { %1441 = vmatprep.subr.mxu0 %v1194_v30 }
 0x323   : > { %1442 = vmatpush3.msra.mxu0 %v1194_v30 }
 0x324   : > { %1443 = vmatprep.subr.mxu0 %v1193_v29 }
 0x325   : > { %1444 = vmatpush3.msra.mxu0 %v1193_v29 }
 0x326   : > { %1445 = vmatprep.subr.mxu0 %v1192_v33 }
 0x327   : > { %1446 = vmatpush3.msra.mxu0 %v1192_v33 }
 0x328   : > { %1447 = vmatprep.subr.mxu0 %v1191_v28 }
 0x329   : > { %1448 = vmatpush3.msra.mxu0 %v1191_v28 }
 0x32a   : > { %1449 = vmatprep.subr.mxu0 %v1190_v62 }
 0x32b   : > { %1450 = vmatpush3.msra.mxu0 %v1190_v62 }
 0x32c   : > { %1451 = vmatprep.subr.mxu0 %v1189_v63 }
 0x32d   : > { %1452 = vmatpush3.msra.mxu0 %v1189_v63 }
 0x32e   : > { %1453 = vmatprep.subr.mxu0 %v1188_v5 }
 0x32f   : > { %1454 = vmatpush3.msra.mxu0 %v1188_v5 }
 0x330   : > { %1455 = vmatprep.subr.mxu0 %v1187_v1 }
 0x331   : > { %1456 = vmatpush3.msra.mxu0 %v1187_v1 }
 0x332   : > { %1457 = vmatprep.subr.mxu0 %v1186_v17 }
 0x333   : > { %1458 = vmatpush3.msra.mxu0 %v1186_v17 }
 0x334   : > { %1459 = vmatprep.subr.mxu0 %v1185_v19 }
 0x335   : > { %1460 = vmatpush3.msra.mxu0 %v1185_v19 }
 0x336   : > { %1461 = vmatprep.subr.mxu0 %v1184_v2 }
 0x337   : > { %1462 = vmatpush3.msra.mxu0 %v1184_v2 }
 0x338   : > { %1463 = vmatprep.subr.mxu0 %v1183_v3 }
 0x339   : > { %1464 = vmatpush3.msra.mxu0 %v1183_v3 }
 0x33a   : > { %1465 = vmatprep.subr.mxu0 %v1182_v4 }
 0x33b   : > { %1466 = vmatpush3.msra.mxu0 %v1182_v4 }
 0x33c   : > { %1467 = vmatprep.subr.mxu0 %v1181_v6 }
 0x33d   : > { %1468 = vmatpush3.msra.mxu0 %v1181_v6 }
 0x33e   : > { %1470 = vmatmul.mubr.f32.vlgmr.msra.gmra.mxu0 %v1998_v21 }
 0x33f   : > { %1472 = vmatprep.mubr.f32.mxu0 %v937_v58 }
 0x3de   : > { %v1075_v8 = vpop.f32.mrf.mxu0  ;;  %v1146_v15 = vpop.f32.mrf.mxu1 }
 0x3df   : > { %v1151_v10 = vadd.f32 %v1408_v7, %v1075_v8  ;;  %v1153_v37 = vadd.f32 %v1410_v14, %v1146_v15 }
 0x3e0   : > { %v1077_v11 = vpop.f32.mrf.mxu0  ;;  %v1148_v39 = vpop.f32.mrf.mxu1 }
 0x3e1   : > { %v1155_v12 = vmul.f32 0.5, %v1151_v10  ;;  %v1152_v13 = vadd.f32 %v1409_v9, %v1077_v11  ;;  %v1154_v40 = vadd.f32 %v1411_v38, %v1148_v39 }
 0x3e3   : > { %1532 = vtanh.f32 %v1155_v12  ;;  %v1159_v36 = vmul.f32 0.5, %v1152_v13  ;;  %v1164_v41 = vmul.f32 0.5, %v1154_v40 }
 0x3e5   : > { %1534 = vtanh.f32 %v1159_v36 }
 0x3e6   : > { %1536 = vtanh.f32 %v1153_v37 }
 0x3e7   : > { %1538 = vtanh.f32 %v1164_v41 }
 0x3f0   : > { %v1533_v21 = vpop.eup %1532 }
 0x3f1   : > { %v1157_v42 = vadd.f32 1.0, %v1533_v21 }
 0x3f2   : > { %v1535_v43 = vpop.eup %1534 }
 0x3f3   : > { %v1158_v44 = vmul.f32 0.5, %v1157_v42  ;;  %v1161_v45 = vadd.f32 1.0, %v1535_v43  ;;  %v1537_v47 = vpop.eup %1536 }
 0x3f4   : > { %v1539_v53 = vpop.eup %1538 }
 0x3f5   : > { %v1162_v46 = vmul.f32 0.5, %v1161_v45  ;;  %v1169_v49 = vmul.f32 %v1537_v47, %v1158_v44  ;;  %v1166_v57 = vadd.f32 1.0, %v1539_v53 }
 0x3f7   : > { %v1168_v48 = vmul.f32 %v1162_v46, %v2056_v34  ;;  %v1167_v61 = vmul.f32 0.5, %v1166_v57 }
 0x3f9   : > { %v1170_v50 = vadd.f32 %v1169_v49, %v1168_v48 }
 0x3fb   : > { %1540 = vtanh.f32 %v1170_v50  ;;  %1176 = vst [vmem:[#allocation5] sm:$0xff] %v1170_v50 }
 0x3fe   : > { %v1471_v51 = vpop.f32.mrf.mxu0 }
 0x3ff   : > { %v1276_v56 = vadd.f32 %v1471_v51, %v1412_v52 }
 0x400   : > { %v1270_v54 = vpop.f32.mrf.mxu0 }
 0x401   : > { %v1271_v55 = vadd.f32 %v1412_v52, %v1270_v54  ;;  %1290 = vst [vmem:[%s1642_s27 + $0x8] sm:$0xff] %v1276_v56 }
 0x403   : > { %1289 = vst [vmem:[%s1642_s27] sm:$0xff] %v1271_v55 }
 0x408   : > { %v1541_v60 = vpop.eup %1540 }
 0x409   : > { %v1172_v16 = vmul.f32 %v1541_v60, %v1167_v61 }
 0x40b   : > { %1175 = vst [vmem:[#allocation4] sm:$0xff] %v1172_v16  ;;  %1473 = vmatmul.mubr.f32.gmra.mxu0 %v1172_v16 }
 0x4cb   : > { %v1474_v18 = vpop.f32.mrf.mxu0 }
 0x4cc   : > { %v1286_v24 = vadd.f32 %v1474_v18, %v1412_v52 }
 0x4cd   : > { %v1280_v20 = vpop.f32.mrf.mxu0 }
 0x4ce   : > { %v1281_v22 = vadd.f32 %v1412_v52, %v1280_v20  ;;  %1292 = vst [vmem:[%s1642_s27 + $0x18] sm:$0xff] %v1286_v24 }
 0x4d0   : > { %1291 = vst [vmem:[%s1642_s27 + $0x10] sm:$0xff] %v1281_v22 }
 0x4d1 PF: > { %s14_s17 = sadd.s32 1, %s1586_s17   ;;  %s2210_s15 = smov %s1582_s16 }
 0x4d2   : > { %p11_p11 = scmp.ge.s32.totalorder %s14_s17, 4   ;;  %s2211_s16 = smov %s2213_s18 }
 0x4d4   :  { %13 = sbr.rel (!%p11_p11) target bundleno = 2 (0x2), region = 76 }
 0x4d9   :  { %1323 = vsyncmov [#allocation6] }
 0x4dc   :  { %s1324_s22 = vpop.sfrf %1323 }
 0x4dd   :  { %p1415_p12 = scmp.ne.s32.totalorder %s1324_s22, 0 }
 0x4df   :  { %1328 = shalt.err (%p1415_p12)  }

</bundles_post_ra>
